<compile_context>
chip_gen: v7x
topology: tpu7x:2x2x1
jax: 0.10.0
libtpu: 0.0.40
codegen_flags: <defaults>
</compile_context>

<pallas_src>
import jax
import jax.numpy as jnp
import numpy as np
from jax.experimental import pallas as pl
from jax.experimental.pallas import tpu as pltpu

# ----- module hyper-parameters (globals `max_deviation` / `eps` in the reference) -----
MAX_DEV = 5.0
EPS = 1e-6
LEAKY_SLOPE = 0.01  # nn.LeakyReLU default

# ----- model config -----
INPUT_DIM = 16
OUTPUT_DIM = 4
HIDDEN_DIM = 32
NUM_HIDDEN_LAYERS = 2
MIXTURE_NUM = 4

HEAD_W = MIXTURE_NUM + 2 * MIXTURE_NUM * OUTPUT_DIM  # 4 + 16 + 16 = 36 fused head cols
HPAD = 128     # lane-dense padded width for hidden activations / fused head matmul
MAX_TB = 2048  # cap on the auto-selected batch tile


def _softclamp(x, lo, hi):
    return lo + (hi - lo) * jax.nn.sigmoid(x)


def _leaky_relu(x):
    return jnp.where(x > 0, x, LEAKY_SLOPE * x)


def _round_up(a, m):
    return ((a + m - 1) // m) * m


# --------------------------------- kernel ---------------------------------
def cgmm_kernel(x_ref, w_ref, b_ref, o_ref):
    # weight slab rows: [ w1 (16,128) | w2 (128,128) | w_head (128,128) ]
    w1 = w_ref[0:INPUT_DIM, :]
    w2 = w_ref[INPUT_DIM:INPUT_DIM + HPAD, :]
    wh = w_ref[INPUT_DIM + HPAD:INPUT_DIM + 2 * HPAD, :]
    cdt = w1.dtype  # storage dtype of x and weights (f32 or bf16)

    # bias/clamp slab rows: b1 | b2 | b_head | clamp_lo | clamp_span | zeros...
    b1 = b_ref[0:1, :]
    b2 = b_ref[1:2, :]
    bh = b_ref[2:3, :]
    lo = b_ref[3:4, :]
    span = b_ref[4:5, :]

    x = x_ref[...]

    # feature MLP: Linear -> Dropout(eval: identity) -> LeakyReLU, twice.
    # Padded columns/rows are zero, so the extra lanes carry exact zeros.
    h = jnp.dot(x, w1, preferred_element_type=jnp.float32) + b1
    h = _leaky_relu(h)
    h = jnp.dot(h.astype(cdt), w2, preferred_element_type=jnp.float32) + b2
    h = _leaky_relu(h)

    # fused heads: one MXU push; store only the HEAD_W useful lanes (narrow output).
    pre = jnp.dot(h.astype(cdt), wh, preferred_element_type=jnp.float32) + bh
    y = lo + span * jax.nn.sigmoid(pre)                 # (TB, 128) f32
    o_ref[...] = y[:, :HEAD_W].astype(o_ref.dtype)      # (TB, 36) narrow store


# ----------------------------- param packing ------------------------------
def pack_params(params, compute_dtype=jnp.bfloat16):
    (w1, b1, w2, b2, wm, bm, wl, bl, ws, bs) = params
    M, D = MIXTURE_NUM, OUTPUT_DIM
    MD = M * D

    def pad_cols(a, n):
        return jnp.pad(a, ((0, 0), (0, n - a.shape[1])))

    # weight slab (272, 128)
    w1p = pad_cols(w1, HPAD)                                                  # (16, 128)
    w2p = jnp.pad(w2, ((0, HPAD - HIDDEN_DIM), (0, HPAD - HIDDEN_DIM)))       # (128, 128)
    wh = jnp.concatenate([wm, wl, ws], axis=1)                                # (32, 36)
    whp = jnp.pad(wh, ((0, HPAD - HIDDEN_DIM), (0, HPAD - HEAD_W)))           # (128, 128)
    w_slab = jnp.concatenate([w1p, w2p, whp], axis=0).astype(compute_dtype)   # (272, 128)

    # bias + clamp slab (8, 128), kept in f32; span = hi - lo precomputed host-side
    bh = jnp.concatenate([bm, bl, bs], axis=1)                                # (1, 36)
    lo = jnp.concatenate(
        [jnp.full((1, M + MD), -MAX_DEV, jnp.float32),
         jnp.full((1, MD), EPS, jnp.float32)], axis=1)                        # (1, 36)
    hi = jnp.full((1, HEAD_W), MAX_DEV, jnp.float32)                          # (1, 36)
    span = hi - lo                                                            # (1, 36)
    b_slab = jnp.concatenate(
        [pad_cols(b1, HPAD), pad_cols(b2, HPAD), pad_cols(bh, HPAD),
         pad_cols(lo, HPAD), pad_cols(span, HPAD),
         jnp.zeros((3, HPAD), jnp.float32)], axis=0).astype(jnp.float32)      # (8, 128)
    return w_slab, b_slab


# -------------------------------- wrapper ---------------------------------
def cgmm_forward(x, params, *, tb=None, compute_dtype=jnp.bfloat16, out_dtype=None):
    """x: (B, INPUT_DIM). Returns (mixture_logits (B,M), locs (B,M,D), scale_diags (B,M,D))."""
    B = x.shape[0]
    M, D = MIXTURE_NUM, OUTPUT_DIM
    MD = M * D

    # strict-f32 path keeps an f32 output; bf16 storage path stores bf16 outputs
    # (values are sigmoid-bounded, |v| <= MAX_DEV).
    if out_dtype is None:
        out_dtype = (jnp.float32 if jnp.dtype(compute_dtype) == jnp.dtype(jnp.float32)
                     else jnp.bfloat16)

    if tb is None:
        # >= 2 grid steps so "parallel" can shard across the two TensorCores on v7x;
        # tiles up to MAX_TB amortize per-step overhead on single-TC v5e/v6e.
        tb = min(MAX_TB, max(256, _round_up(pl.cdiv(B, 2), 256)))

    w_slab, b_slab = pack_params(params, compute_dtype)

    nb = pl.cdiv(B, tb)
    b_pad = nb * tb
    xp = x.astype(compute_dtype)
    if b_pad != B:
        xp = jnp.pad(xp, ((0, b_pad - B), (0, 0)))   # remainder rows are zeros, sliced off

    out = pl.pallas_call(
        cgmm_kernel,
        out_shape=jax.ShapeDtypeStruct((b_pad, HEAD_W), out_dtype),
        grid_spec=pltpu.PrefetchScalarGridSpec(
            num_scalar_prefetch=0,
            grid=(nb,),
            in_specs=[
                pl.BlockSpec((tb, INPUT_DIM), lambda i: (i, 0)),
                pl.BlockSpec(w_slab.shape, lambda i: (0, 0)),
                pl.BlockSpec(b_slab.shape, lambda i: (0, 0)),
            ],
            # narrow output: last block dim equals full array dim (full-dim exception)
            out_specs=pl.BlockSpec((tb, HEAD_W), lambda i: (i, 0)),
        ),
        compiler_params=pltpu.CompilerParams(
            dimension_semantics=("parallel",),
        ),
    )(xp, w_slab, b_slab)

    # glue: single fused read of the narrow (B, 36) slab, split into the 3 tensors
    out = out[:B, :].astype(jnp.float32)
    mix = out[:, :M]
    loc = out[:, M:M + MD].reshape(B, M, D)
    scale = out[:, M + MD:M + 2 * MD].reshape(B, M, D)
    return mix, loc, scale


# ---------------- deterministic parameter init (PyTorch-style uniform) ----------------
def init_params(key):
    def linear(key, fan_in, fan_out, bias_const=None):
        kw, kb = jax.random.split(key)
        bound = 1.0 / np.sqrt(fan_in)
        w = jax.random.uniform(kw, (fan_in, fan_out), jnp.float32, -bound, bound)
        if bias_const is None:
            b = jax.random.uniform(kb, (1, fan_out), jnp.float32, -bound, bound)
        else:
            b = jnp.full((1, fan_out), bias_const, jnp.float32)
        return w, b

    keys = jax.random.split(key, 5)
    w1, b1 = linear(keys[0], INPUT_DIM, HIDDEN_DIM)
    w2, b2 = linear(keys[1], HIDDEN_DIM, HIDDEN_DIM)
    wm, bm = linear(keys[2], HIDDEN_DIM, MIXTURE_NUM)
    wl, bl = linear(keys[3], HIDDEN_DIM, MIXTURE_NUM * OUTPUT_DIM)
    # identity_covariance=False branch: scale_diag bias initialized to 0.05
    ws, bs = linear(keys[4], HIDDEN_DIM, MIXTURE_NUM * OUTPUT_DIM, bias_const=0.05)
    return (w1, b1, w2, b2, wm, bm, wl, bl, ws, bs)


# ---------------- pure-JAX reference (for correctness check) ----------------
def cgmm_ref(x, params, compute_dtype=jnp.float32):
    (w1, b1, w2, b2, wm, bm, wl, bl, ws, bs) = params
    B = x.shape[0]

    def dot(a, w):
        return jnp.dot(a.astype(compute_dtype), w.astype(compute_dtype),
                       preferred_element_type=jnp.float32)

    h = _leaky_relu(dot(x, w1) + b1)
    h = _leaky_relu(dot(h, w2) + b2)
    mix = _softclamp(dot(h, wm) + bm, -MAX_DEV, MAX_DEV)
    loc = _softclamp(dot(h, wl) + bl, -MAX_DEV, MAX_DEV).reshape(B, MIXTURE_NUM, OUTPUT_DIM)
    scale = _softclamp(dot(h, ws) + bs, EPS, MAX_DEV).reshape(B, MIXTURE_NUM, OUTPUT_DIM)
    return mix, loc, scale


if __name__ == "__main__":
    key = jax.random.PRNGKey(0)
    kx, kp = jax.random.split(key)
    B = 500  # not a multiple of the tile: exercises cdiv + batch-padding + 2-step grid
    x = jax.random.normal(kx, (B, INPUT_DIM), jnp.float32)
    params = init_params(kp)

    # ---- f32 storage path: strict parity with reference (f32 output) ----
    mix, loc, scale = jax.block_until_ready(
        cgmm_forward(x, params, compute_dtype=jnp.float32))
    mix_r, loc_r, scale_r = cgmm_ref(x, params)
    np.testing.assert_allclose(np.asarray(mix), np.asarray(mix_r), rtol=1e-4, atol=1e-4)
    np.testing.assert_allclose(np.asarray(loc), np.asarray(loc_r), rtol=1e-4, atol=1e-4)
    np.testing.assert_allclose(np.asarray(scale), np.asarray(scale_r), rtol=1e-4, atol=1e-4)

    # ---- default bf16 storage path (f32 accumulation / element-wise, bf16 output) ----
    mix_b, loc_b, scale_b = jax.block_until_ready(
        cgmm_forward(x, params, compute_dtype=jnp.bfloat16))
    mix_rb, loc_rb, scale_rb = cgmm_ref(x, params, compute_dtype=jnp.bfloat16)
    np.testing.assert_allclose(np.asarray(mix_b), np.asarray(mix_rb), rtol=2e-2, atol=2e-2)
    np.testing.assert_allclose(np.asarray(loc_b), np.asarray(loc_rb), rtol=2e-2, atol=2e-2)
    np.testing.assert_allclose(np.asarray(scale_b), np.asarray(scale_rb), rtol=2e-2, atol=2e-2)

    print("KERNEL_OK")
</pallas_src>

<mosaic_0001>
module attributes {stable_mosaic.version = 11 : i64} {
  func.func @cgmm_kernel(%arg0: i32, %arg1: memref<256x16xf32, #tpu.memory_space<vmem>>, %arg2: memref<272x128xf32, #tpu.memory_space<vmem>>, %arg3: memref<8x128xf32, #tpu.memory_space<vmem>>, %arg4: memref<256x36xf32, #tpu.memory_space<vmem>>) attributes {dimension_semantics = [#tpu.dimension_semantics<parallel>], iteration_bounds = array<i64: 2>, scalar_prefetch = 0 : i64, scratch_operands = 0 : i64, tpu.core_type = #tpu.core_type<tc>, window_params = [{transform_indices = @transform_0, window_bounds = array<i64: 256, 16>}, {pipeline_mode = #tpu.pipeline_mode<synchronous>, transform_indices = @transform_1, window_bounds = array<i64: 272, 128>}, {pipeline_mode = #tpu.pipeline_mode<synchronous>, transform_indices = @transform_2, window_bounds = array<i64: 8, 128>}, {transform_indices = @transform_3, window_bounds = array<i64: 256, 36>}]} {
    %c0 = arith.constant 0 : index
    %c0_0 = arith.constant 0 : index
    %0 = vector.load %arg2[%c0, %c0_0] : memref<272x128xf32, #tpu.memory_space<vmem>>, vector<16x128xf32>
    %c16 = arith.constant 16 : index
    %c0_1 = arith.constant 0 : index
    %1 = vector.load %arg2[%c16, %c0_1] : memref<272x128xf32, #tpu.memory_space<vmem>>, vector<128x128xf32>
    %c144 = arith.constant 144 : index
    %c0_2 = arith.constant 0 : index
    %2 = vector.load %arg2[%c144, %c0_2] : memref<272x128xf32, #tpu.memory_space<vmem>>, vector<128x128xf32>
    %c0_3 = arith.constant 0 : index
    %c0_4 = arith.constant 0 : index
    %3 = vector.load %arg3[%c0_3, %c0_4] : memref<8x128xf32, #tpu.memory_space<vmem>>, vector<1x128xf32>
    %c1 = arith.constant 1 : index
    %c0_5 = arith.constant 0 : index
    %4 = vector.load %arg3[%c1, %c0_5] : memref<8x128xf32, #tpu.memory_space<vmem>>, vector<1x128xf32>
    %c2 = arith.constant 2 : index
    %c0_6 = arith.constant 0 : index
    %5 = vector.load %arg3[%c2, %c0_6] : memref<8x128xf32, #tpu.memory_space<vmem>>, vector<1x128xf32>
    %c3 = arith.constant 3 : index
    %c0_7 = arith.constant 0 : index
    %6 = vector.load %arg3[%c3, %c0_7] : memref<8x128xf32, #tpu.memory_space<vmem>>, vector<1x128xf32>
    %c4 = arith.constant 4 : index
    %c0_8 = arith.constant 0 : index
    %7 = vector.load %arg3[%c4, %c0_8] : memref<8x128xf32, #tpu.memory_space<vmem>>, vector<1x128xf32>
    %c0_9 = arith.constant 0 : index
    %c0_10 = arith.constant 0 : index
    %8 = vector.load %arg1[%c0_9, %c0_10] : memref<256x16xf32, #tpu.memory_space<vmem>>, vector<256x16xf32>
    %cst = arith.constant dense<0.000000e+00> : vector<256x128xf32>
    %9 = tpu.matmul %8, %0, %cst {dimension_numbers = #tpu.dot_dimension_numbers<[1], [0], [0], [1], [0, 0, 1, 1], [], []>} : vector<256x16xf32>, vector<16x128xf32>, vector<256x128xf32> -> vector<256x128xf32>
    %10 = vector.broadcast %3 : vector<1x128xf32> to vector<256x128xf32>
    %11 = arith.addf %9, %10 : vector<256x128xf32>
    %cst_11 = arith.constant 0.000000e+00 : f32
    %12 = vector.broadcast %cst_11 : f32 to vector<256x128xf32>
    %13 = arith.cmpf ogt, %11, %12 : vector<256x128xf32>
    %cst_12 = arith.constant 0.00999999977 : f32
    %14 = vector.broadcast %cst_12 : f32 to vector<256x128xf32>
    %15 = arith.mulf %14, %11 : vector<256x128xf32>
    %16 = arith.select %13, %11, %15 : vector<256x128xi1>, vector<256x128xf32>
    %cst_13 = arith.constant dense<0.000000e+00> : vector<256x128xf32>
    %17 = tpu.matmul %16, %1, %cst_13 {dimension_numbers = #tpu.dot_dimension_numbers<[1], [0], [0], [1], [0, 0, 1, 1], [], []>} : vector<256x128xf32>, vector<128x128xf32>, vector<256x128xf32> -> vector<256x128xf32>
    %18 = vector.broadcast %4 : vector<1x128xf32> to vector<256x128xf32>
    %19 = arith.addf %17, %18 : vector<256x128xf32>
    %cst_14 = arith.constant 0.000000e+00 : f32
    %20 = vector.broadcast %cst_14 : f32 to vector<256x128xf32>
    %21 = arith.cmpf ogt, %19, %20 : vector<256x128xf32>
    %cst_15 = arith.constant 0.00999999977 : f32
    %22 = vector.broadcast %cst_15 : f32 to vector<256x128xf32>
    %23 = arith.mulf %22, %19 : vector<256x128xf32>
    %24 = arith.select %21, %19, %23 : vector<256x128xi1>, vector<256x128xf32>
    %cst_16 = arith.constant dense<0.000000e+00> : vector<256x128xf32>
    %25 = tpu.matmul %24, %2, %cst_16 {dimension_numbers = #tpu.dot_dimension_numbers<[1], [0], [0], [1], [0, 0, 1, 1], [], []>} : vector<256x128xf32>, vector<128x128xf32>, vector<256x128xf32> -> vector<256x128xf32>
    %26 = vector.broadcast %5 : vector<1x128xf32> to vector<256x128xf32>
    %27 = arith.addf %25, %26 : vector<256x128xf32>
    %28 = arith.negf %27 : vector<256x128xf32>
    %29 = math.exp %28 : vector<256x128xf32>
    %cst_17 = arith.constant 1.000000e+00 : f32
    %30 = vector.broadcast %cst_17 : f32 to vector<256x128xf32>
    %31 = arith.addf %30, %29 : vector<256x128xf32>
    %32 = arith.divf %30, %31 : vector<256x128xf32>
    %33 = vector.broadcast %7 : vector<1x128xf32> to vector<256x128xf32>
    %34 = arith.mulf %33, %32 : vector<256x128xf32>
    %35 = vector.broadcast %6 : vector<1x128xf32> to vector<256x128xf32>
    %36 = arith.addf %35, %34 : vector<256x128xf32>
    %37 = vector.extract_strided_slice %36 {offsets = [0, 0], sizes = [256, 36], strides = [1, 1]} : vector<256x128xf32> to vector<256x36xf32>
    %c0_18 = arith.constant 0 : index
    %c0_19 = arith.constant 0 : index
    %38 = vector.load %arg4[%c0_18, %c0_19] : memref<256x36xf32, #tpu.memory_space<vmem>>, vector<256x36xf32>
    tpu.vector_store %arg4[%c0_18, %c0_19], %37 {strides = array<i32>} : memref<256x36xf32, #tpu.memory_space<vmem>>, vector<256x36xf32>,
    return
  }
  func.func @transform_0(%arg0: i32) -> (i32, i32) {
    %c0_i32 = arith.constant 0 : i32
    %c0_i32_0 = arith.constant 0 : i32
    return %arg0, %c0_i32 : i32, i32
  }
  func.func @transform_1(%arg0: i32) -> (i32, i32) {
    %c0_i32 = arith.constant 0 : i32
    %c0_i32_0 = arith.constant 0 : i32
    %c0_i32_1 = arith.constant 0 : i32
    return %c0_i32, %c0_i32_0 : i32, i32
  }
  func.func @transform_2(%arg0: i32) -> (i32, i32) {
    %c0_i32 = arith.constant 0 : i32
    %c0_i32_0 = arith.constant 0 : i32
    %c0_i32_1 = arith.constant 0 : i32
    return %c0_i32, %c0_i32_0 : i32, i32
  }
  func.func @transform_3(%arg0: i32) -> (i32, i32) {
    %c0_i32 = arith.constant 0 : i32
    %c0_i32_0 = arith.constant 0 : i32
    return %arg0, %c0_i32 : i32, i32
  }
}

</mosaic_0001>

<bundles_post_ra>
// kernel: tpu_custom_call.1
= control target key start
LH: loop header
LB: loop body
LE: loop exit
PB: predicated region body
PF: predicated region fallthrough
CT: control target
= control target key end

     0   :  { %s2230_s12 = smov 0   ;;  %s2715_s0 = inlined_call_operand.vmem [shape: f32[512,16], index: 0, kind: input, shape index: {}]   ;;  %s2716_s1 = inlined_call_operand.vmem [shape: f32[272,128], index: 1, kind: input, shape index: {}]   ;;  %s2717_s2 = inlined_call_operand.vmem [shape: f32[8,128], index: 2, kind: input, shape index: {}]   ;;  %s2718_s3 = inlined_call_operand.vmem [shape: f32[512,36], index: 3, kind: output, shape index: {}]  }
   0x1 LB: > { %s1574_s13 = sadd.s32 4294967295, %s2208_s12   ;;  %p1578_p0 = scmp.ge.s32.totalorder %s2208_s12, 1  ;;  %s2208_s12 = sphi %s2230_s12, %s13_s12  }
   0x2   : > { %p138_p1 = scmp.lt.s32.totalorder %s2208_s12, 3 }
   0x4   : > { %p139_p2 = pnand %p1578_p0, %p138_p1 }
   0x5   : > { %v174_v0 = vld [vmem:[%s2716_s1] sm:$0xff] (!%p139_p2)  ;;  %v175_v1 = vld [vmem:[%s2716_s1 + $0x8] sm:$0xff] (!%p139_p2)  ;;  %s1579_s18 = sshll.u32 (!%p139_p2), %s1574_s13, 5  ;;  %v176_v2 = vld [vmem:[%s2716_s1 + $0x10] sm:$0xff] (!%p139_p2)  ;;  %vm249_vm0 = vcmask (!%p139_p2), 130048  }
   0x6   : > { %142 = sbr.rel (%p139_p2) target bundleno = 765 (0x2fd), region = 32  ;;  %v1996_v3 = vpack.c.bf16 (!%p139_p2), %v175_v1, %v174_v0  ;;  %p163_p3 = scmp.lt.s32.totalorder (!%p139_p2), %s1579_s18, 63  ;;  %v177_v4 = vld [vmem:[%s2716_s1 + $0x18] sm:$0xff] (!%p139_p2)  ;;  %v178_v9 = vld [vmem:[%s2716_s1 + $0x20] sm:$0xff] (!%p139_p2)  ;;  %v179_v10 = vld [vmem:[%s2716_s1 + $0x28] sm:$0xff] (!%p139_p2) }
   0x7   : > { %v2000_v5 = vpack.c.bf16 (!%p139_p2), %v177_v4, %v176_v2  ;;  %v2004_v15 = vpack.c.bf16 (!%p139_p2), %v179_v10, %v178_v9  ;;  %v180_v17 = vld [vmem:[%s2716_s1 + $0x30] sm:$0xff] (!%p139_p2)  ;;  %v181_v18 = vld [vmem:[%s2716_s1 + $0x38] sm:$0xff] (!%p139_p2)  ;;  %v182_v24 = vld [vmem:[%s2716_s1 + $0x40] sm:$0xff] (!%p139_p2) }
   0x8   : > { %1997 = vmatprep.subr.bf16.mxu0 (!%p139_p2), %v1996_v3  ;;  %2064 = vmatprep.subr.bf16.mxu1 (!%p139_p2), %v1996_v3  ;;  %v2008_v23 = vpack.c.bf16 (!%p139_p2), %v181_v18, %v180_v17  ;;  %v183_v25 = vld [vmem:[%s2716_s1 + $0x48] sm:$0xff] (!%p139_p2)  ;;  %v184_v31 = vld [vmem:[%s2716_s1 + $0x50] sm:$0xff] (!%p139_p2)  ;;  %v185_v32 = vld [vmem:[%s2716_s1 + $0x58] sm:$0xff] (!%p139_p2) }
   0x9   : > { %1999 = vmatpush3.bf16.msra.mxu0 (!%p139_p2), %v1996_v3  ;;  %2065 = vmatpush3.bf16.msra.mxu1 (!%p139_p2), %v1996_v3  ;;  %v2012_v30 = vpack.c.bf16 (!%p139_p2), %v183_v25, %v182_v24  ;;  %v2016_v37 = vpack.c.bf16 (!%p139_p2), %v185_v32, %v184_v31  ;;  %v186_v38 = vld [vmem:[%s2716_s1 + $0x60] sm:$0xff] (!%p139_p2)  ;;  %v187_v39 = vld [vmem:[%s2716_s1 + $0x68] sm:$0xff] (!%p139_p2)  ;;  %v188_v45 = vld [vmem:[%s2716_s1 + $0x70] sm:$0xff] (!%p139_p2) }
   0xa   : > { %2001 = vmatprep.subr.bf16.mxu1 (!%p139_p2), %v2000_v5  ;;  %v2020_v44 = vpack.c.bf16 (!%p139_p2), %v187_v39, %v186_v38  ;;  %v189_v46 = vld [vmem:[%s2716_s1 + $0x78] sm:$0xff] (!%p139_p2)  ;;  %v190_v56 = vld [vmem:[%s2716_s1 + $0x80] sm:$0xff] (!%p139_p2)  ;;  %v191_v57 = vld [vmem:[%s2716_s1 + $0x88] sm:$0xff] (!%p139_p2) }
   0xb   : > { %v2024_v51 = vpack.c.bf16 (!%p139_p2), %v189_v46, %v188_v45  ;;  %v2028_v58 = vpack.c.bf16 (!%p139_p2), %v191_v57, %v190_v56  ;;  %v192_v59 = vld [vmem:[%s2716_s1 + $0x90] sm:$0xff] (!%p139_p2)  ;;  %v193_v60 = vld [vmem:[%s2716_s1 + $0x98] sm:$0xff] (!%p139_p2)  ;;  %v194_v61 = vld [vmem:[%s2716_s1 + $0xa0] sm:$0xff] (!%p139_p2) }
   0xc   : > { %v2032_v62 = vpack.c.bf16 (!%p139_p2), %v193_v60, %v192_v59  ;;  %v195_v63 = vld [vmem:[%s2716_s1 + $0xa8] sm:$0xff] (!%p139_p2)  ;;  %v196_v1 = vld [vmem:[%s2716_s1 + $0xb0] sm:$0xff] (!%p139_p2)  ;;  %v197_v2 = vld [vmem:[%s2716_s1 + $0xb8] sm:$0xff] (!%p139_p2) }
   0xd   : > { %s2720_s18 = smov (!%p163_p3, %s1579_s18), 63  ;;  %v2036_v0 = vpack.c.bf16 %v195_v63, %v194_v61  ;;  %v2040_v3 = vpack.c.bf16 %v197_v2, %v196_v1  ;;  %v198_v4 = vld [vmem:[%s2716_s1 + $0xc0] sm:$0xff] }
   0xe   : > { %s1580_s23 = sshll.u32 %s2720_s18, 3  ;;  %2033 = vmatprep.subr.bf16.mxu0 %v2032_v62  ;;  %v202_v10 = vld [vmem:[%s2716_s1 + $0xe0] sm:$0xff] }
   0xf   : > { %s2258_s26 = scalar_lea.vmem %s2715_s0, %s1580_s23  ;;  %s2566_s28 = scalar_lea.vmem %s2718_s3, %s1580_s23 }
  0x10   : > { %v213_v6 = vld [vmem:[%s2258_s26] sm:$0xff]  ;;  %v214_v7 = vld [vmem:[%s2258_s26 + $0x8] sm:$0xff]  ;;  %v215_v8 = vld [vmem:[%s2258_s26 + $0x10] sm:$0xff] }
  0x11   : > { %1788 = vmatprep.mubr.msk.f32.mxu0 %vm249_vm0, %v213_v6  ;;  %v216_v11 = vld [vmem:[%s2258_s26 + $0x18] sm:$0xff]  ;;  %v217_v12 = vld [vmem:[%s2258_s26 + $0x20] sm:$0xff]  ;;  %v230_v14 = vld [vmem:[%s2258_s26 + $0x88] sm:$0xff] }
  0x12   : > { %1789 = vmatmul.mubr.msk.f32.vlgmr.msra.gmra.mrb[0].mxu0 %vm249_vm0, %v214_v7  ;;  %v229_v13 = vld [vmem:[%s2258_s26 + $0x80] sm:$0xff]  ;;  %v231_v16 = vld [vmem:[%s2258_s26 + $0x90] sm:$0xff]  ;;  %v218_v19 = vld [vmem:[%s2258_s26 + $0x28] sm:$0xff] }
  0x13   : > { %1791 = vmatprep.mubr.msk.f32.mxu0 %vm249_vm0, %v215_v8  ;;  %1812 = vmatprep.mubr.msk.f32.mxu1 %vm249_vm0, %v229_v13  ;;  %v219_v20 = vld [vmem:[%s2258_s26 + $0x30] sm:$0xff]  ;;  %v232_v21 = vld [vmem:[%s2258_s26 + $0x98] sm:$0xff]  ;;  %v233_v22 = vld [vmem:[%s2258_s26 + $0xa0] sm:$0xff] }
  0x14   : > { %1813 = vmatmul.mubr.msk.f32.vlgmr.msra.gmra.mrb[0].mxu1 %vm249_vm0, %v230_v14  ;;  %v220_v26 = vld [vmem:[%s2258_s26 + $0x38] sm:$0xff]  ;;  %v221_v27 = vld [vmem:[%s2258_s26 + $0x40] sm:$0xff]  ;;  %v234_v28 = vld [vmem:[%s2258_s26 + $0xa8] sm:$0xff]  ;;  %2035 = vmatpush3.bf16.msra.mxu0 %v2032_v62 }
  0x15   : > { %1815 = vmatprep.mubr.msk.f32.mxu1 %vm249_vm0, %v231_v16  ;;  %2003 = vmatpush3.bf16.msra.mxu1 %v2000_v5  ;;  %v235_v29 = vld [vmem:[%s2258_s26 + $0xb0] sm:$0xff]  ;;  %v222_v33 = vld [vmem:[%s2258_s26 + $0x48] sm:$0xff]  ;;  %v236_v35 = vld [vmem:[%s2258_s26 + $0xb8] sm:$0xff] }
  0x16   : > { %1792 = vmatmul.mubr.msk.f32.gmra.mrb[2].mxu0 %vm249_vm0, %v216_v11  ;;  %2005 = vmatprep.subr.bf16.mxu1 %v2004_v15  ;;  %v223_v34 = vld [vmem:[%s2258_s26 + $0x50] sm:$0xff]  ;;  %v237_v36 = vld [vmem:[%s2258_s26 + $0xc0] sm:$0xff]  ;;  %v224_v40 = vld [vmem:[%s2258_s26 + $0x58] sm:$0xff] }
  0x17   : > { %1794 = vmatprep.mubr.msk.f32.mxu0 %vm249_vm0, %v217_v12  ;;  %v225_v41 = vld [vmem:[%s2258_s26 + $0x60] sm:$0xff]  ;;  %v238_v42 = vld [vmem:[%s2258_s26 + $0xc8] sm:$0xff]  ;;  %v239_v43 = vld [vmem:[%s2258_s26 + $0xd0] sm:$0xff]  ;;  %2037 = vmatprep.subr.bf16.mxu0 %v2036_v0 }
  0x18   : > { %1816 = vmatmul.mubr.msk.f32.gmra.mrb[2].mxu1 %vm249_vm0, %v232_v21  ;;  %v226_v47 = vld [vmem:[%s2258_s26 + $0x68] sm:$0xff]  ;;  %v227_v48 = vld [vmem:[%s2258_s26 + $0x70] sm:$0xff]  ;;  %v240_v49 = vld [vmem:[%s2258_s26 + $0xd8] sm:$0xff]  ;;  %2039 = vmatpush3.bf16.msra.mxu0 %v2036_v0 }
  0x19   : > { %1818 = vmatprep.mubr.msk.f32.mxu1 %vm249_vm0, %v233_v22  ;;  %2007 = vmatpush3.bf16.msra.mxu1 %v2004_v15  ;;  %v241_v50 = vld [vmem:[%s2258_s26 + $0xe0] sm:$0xff]  ;;  %v228_v52 = vld [vmem:[%s2258_s26 + $0x78] sm:$0xff]  ;;  %v242_v53 = vld [vmem:[%s2258_s26 + $0xe8] sm:$0xff] }
  0x1a   : > { %1795 = vmatmul.mubr.msk.f32.gmra.mrb[4].mxu0 %vm249_vm0, %v218_v19  ;;  %2009 = vmatprep.subr.bf16.mxu1 %v2008_v23  ;;  %v243_v54 = vld [vmem:[%s2258_s26 + $0xf0] sm:$0xff]  ;;  %v244_v55 = vld [vmem:[%s2258_s26 + $0xf8] sm:$0xff]  ;;  %v199_v5 = vld [vmem:[%s2716_s1 + $0xc8] sm:$0xff] }
  0x1b   : > { %1797 = vmatprep.mubr.msk.f32.mxu0 %vm249_vm0, %v219_v20  ;;  %2041 = vmatprep.subr.bf16.mxu0 %v2040_v3  ;;  %v2044_v6 = vpack.c.bf16 %v199_v5, %v198_v4  ;;  %v200_v7 = vld [vmem:[%s2716_s1 + $0xd0] sm:$0xff]  ;;  %v201_v8 = vld [vmem:[%s2716_s1 + $0xd8] sm:$0xff]  ;;  %v203_v11 = vld [vmem:[%s2716_s1 + $0xe8] sm:$0xff] }
  0x1c   : > { %1819 = vmatmul.mubr.msk.f32.gmra.mrb[4].mxu1 %vm249_vm0, %v234_v28  ;;  %2043 = vmatpush3.bf16.msra.mxu0 %v2040_v3  ;;  %v2048_v9 = vpack.c.bf16 %v201_v8, %v200_v7  ;;  %v2052_v12 = vpack.c.bf16 %v203_v11, %v202_v10  ;;  %v204_v13 = vld [vmem:[%s2716_s1 + $0xf0] sm:$0xff]  ;;  %v205_v14 = vld [vmem:[%s2716_s1 + $0xf8] sm:$0xff]  ;;  %v2411_v16 = vld [vmem:[%s2717_s2] ss:$0 sm:$0xff] }
  0x1d   : > { %1821 = vmatprep.mubr.msk.f32.mxu1 %vm249_vm0, %v235_v29  ;;  %2011 = vmatpush3.bf16.msra.mxu1 %v2008_v23  ;;  %v2056_v15 = vpack.c.bf16 %v205_v14, %v204_v13 }
  0x1e   : > { %1798 = vmatmul.mubr.msk.f32.gmra.mrb[6].mxu0 %vm249_vm0, %v220_v26  ;;  %2013 = vmatprep.subr.bf16.mxu1 %v2012_v30 }
  0x1f   : > { %1800 = vmatprep.mubr.msk.f32.mxu0 %vm249_vm0, %v221_v27  ;;  %2045 = vmatprep.subr.bf16.mxu0 %v2044_v6 }
  0x20   : > { %1822 = vmatmul.mubr.msk.f32.gmra.mrb[6].mxu1 %vm249_vm0, %v236_v35  ;;  %2047 = vmatpush3.bf16.msra.mxu0 %v2044_v6 }
  0x21   : > { %1824 = vmatprep.mubr.msk.f32.mxu1 %vm249_vm0, %v237_v36  ;;  %2015 = vmatpush3.bf16.msra.mxu1 %v2012_v30 }
  0x22   : > { %1801 = vmatmul.mubr.msk.f32.gmra.mrb[8].mxu0 %vm249_vm0, %v222_v33  ;;  %2017 = vmatprep.subr.bf16.mxu1 %v2016_v37 }
  0x23   : > { %1803 = vmatprep.mubr.msk.f32.mxu0 %vm249_vm0, %v223_v34  ;;  %2049 = vmatprep.subr.bf16.mxu0 %v2048_v9 }
  0x24   : > { %1825 = vmatmul.mubr.msk.f32.gmra.mrb[8].mxu1 %vm249_vm0, %v238_v42  ;;  %2051 = vmatpush3.bf16.msra.mxu0 %v2048_v9 }
  0x25   : > { %1827 = vmatprep.mubr.msk.f32.mxu1 %vm249_vm0, %v239_v43  ;;  %2019 = vmatpush3.bf16.msra.mxu1 %v2016_v37 }
  0x26   : > { %1804 = vmatmul.mubr.msk.f32.gmra.mrb[10].mxu0 %vm249_vm0, %v224_v40  ;;  %2021 = vmatprep.subr.bf16.mxu1 %v2020_v44 }
  0x27   : > { %1806 = vmatprep.mubr.msk.f32.mxu0 %vm249_vm0, %v225_v41  ;;  %2053 = vmatprep.subr.bf16.mxu0 %v2052_v12 }
  0x28   : > { %1828 = vmatmul.mubr.msk.f32.gmra.mrb[10].mxu1 %vm249_vm0, %v240_v49  ;;  %2055 = vmatpush3.bf16.msra.mxu0 %v2052_v12 }
  0x29   : > { %1830 = vmatprep.mubr.msk.f32.mxu1 %vm249_vm0, %v241_v50  ;;  %2023 = vmatpush3.bf16.msra.mxu1 %v2020_v44 }
  0x2a   : > { %1807 = vmatmul.mubr.msk.f32.gmra.mrb[12].mxu0 %vm249_vm0, %v226_v47  ;;  %2025 = vmatprep.subr.bf16.mxu1 %v2024_v51 }
  0x2b   : > { %1809 = vmatprep.mubr.msk.f32.mxu0 %vm249_vm0, %v227_v48  ;;  %2057 = vmatprep.subr.bf16.mxu0 %v2056_v15 }
  0x2c   : > { %1831 = vmatmul.mubr.msk.f32.gmra.mrb[12].mxu1 %vm249_vm0, %v242_v53  ;;  %2059 = vmatpush3.bf16.msra.mxu0 %v2056_v15 }
  0x2d   : > { %1833 = vmatprep.mubr.msk.f32.mxu1 %vm249_vm0, %v243_v54  ;;  %2027 = vmatpush3.bf16.msra.mxu1 %v2024_v51 }
  0x2e   : > { %1810 = vmatmul.mubr.msk.f32.gmra.mrb[14].mxu0 %vm249_vm0, %v228_v52  ;;  %2029 = vmatprep.subr.bf16.mxu1 %v2028_v58 }
  0x30   : > { %1834 = vmatmul.mubr.msk.f32.gmra.mrb[14].mxu1 %vm249_vm0, %v244_v55 }
  0x31   : > { %2031 = vmatpush3.bf16.msra.mxu1 %v2028_v58 }
  0xe5   : > { %v1790_v17 = vpop.f32.mrb[0].mxu0 }
  0xe6   : > { %v418_v18 = vadd.f32 %v1790_v17, %v2411_v16  ;;  %v412_v19 = vpop.f32.mrb[1].mxu0 }
  0xe7   : > { %v413_v20 = vadd.f32 %v2411_v16, %v412_v19  ;;  %v2416_v26 = vpop.f32.mrb[0].mxu1 }
  0xe8   : > { %v604_v21 = vmul.f32 0.01, %v418_v18  ;;  %vm572_vm1 = vcmp.gt.f32.partialorder %v418_v18, 0.0  ;;  %v2419_v29 = vpop.f32.mrb[1].mxu1 }
  0xe9   : > { %v603_v22 = vmul.f32 0.01, %v413_v20  ;;  %v1793_v23 = vpop.f32.mrb[2].mxu0  ;;  %vm571_vm2 = vcmp.gt.f32.partialorder %v413_v20, 0.0  ;;  %v493_v15 = vadd.f32 %v2411_v16, %v2419_v29 }
  0xea   : > { %v428_v24 = vadd.f32 %v1793_v23, %v2411_v16  ;;  %v422_v25 = vpop.f32.mrb[3].mxu0  ;;  %v636_v30 = vsel %vm572_vm1, %v418_v18, %v604_v21 }
  0xeb   : > { %v423_v27 = vadd.f32 %v2411_v16, %v422_v25  ;;  %v635_v28 = vsel %vm571_vm2, %v413_v20, %v603_v22  ;;  %v2422_v36 = vpop.f32.mrb[2].mxu1  ;;  %vm587_vm15 = vcmp.gt.f32.partialorder %v493_v15, 0.0 }
  0xec   : > { %v606_v31 = vmul.f32 0.01, %v428_v24  ;;  %1868 = vmatprep.mubr.f32.mxu1 %v635_v28  ;;  %vm574_vm4 = vcmp.gt.f32.partialorder %v428_v24, 0.0  ;;  %v2425_v39 = vpop.f32.mrb[3].mxu1 }
  0xed   : > { %v605_v32 = vmul.f32 0.01, %v423_v27  ;;  %v1796_v33 = vpop.f32.mrb[4].mxu0  ;;  %1869 = vmatmul.mubr.f32.vlgmr.msra.gmra.mrb[16].mxu1 %v636_v30  ;;  %vm573_vm3 = vcmp.gt.f32.partialorder %v423_v27, 0.0  ;;  %v503_v29 = vadd.f32 %v2411_v16, %v2425_v39 }
  0xee   : > { %v438_v34 = vadd.f32 %v1796_v33, %v2411_v16  ;;  %v432_v35 = vpop.f32.mrb[5].mxu0  ;;  %v638_v41 = vsel %vm574_vm4, %v428_v24, %v606_v31 }
  0xef   : > { %v433_v37 = vadd.f32 %v2411_v16, %v432_v35  ;;  %v637_v38 = vsel %vm573_vm3, %v423_v27, %v605_v32  ;;  %v2428_v46 = vpop.f32.mrb[4].mxu1  ;;  %v619_v27 = vmul.f32 0.01, %v493_v15  ;;  %v498_v32 = vadd.f32 %v2416_v26, %v2411_v16 }
  0xf0   : > { %v608_v40 = vmul.f32 0.01, %v438_v34  ;;  %1871 = vmatprep.mubr.f32.mxu1 %v637_v38  ;;  %vm576_vm6 = vcmp.gt.f32.partialorder %v438_v34, 0.0  ;;  %v2431_v49 = vpop.f32.mrb[5].mxu1  ;;  %v508_v26 = vadd.f32 %v2422_v36, %v2411_v16  ;;  %vm589_vm2 = vcmp.gt.f32.partialorder %v503_v29, 0.0 }
  0xf1   : > { %v607_v42 = vmul.f32 0.01, %v433_v37  ;;  %v1799_v43 = vpop.f32.mrb[6].mxu0  ;;  %1872 = vmatmul.mubr.f32.gmra.mrb[18].mxu1 %v638_v41  ;;  %vm575_vm5 = vcmp.gt.f32.partialorder %v433_v37, 0.0  ;;  %v513_v39 = vadd.f32 %v2411_v16, %v2431_v49  ;;  %vm588_vm3 = vcmp.gt.f32.partialorder %v498_v32, 0.0 }
  0xf2   : > { %v448_v44 = vadd.f32 %v1799_v43, %v2411_v16  ;;  %v442_v45 = vpop.f32.mrb[7].mxu0  ;;  %v640_v51 = vsel %vm576_vm6, %v438_v34, %v608_v40  ;;  %v651_v40 = vsel %vm587_vm15, %v493_v15, %v619_v27  ;;  %v518_v49 = vadd.f32 %v2428_v46, %v2411_v16 }
  0xf3   : > { %v443_v47 = vadd.f32 %v2411_v16, %v442_v45  ;;  %v639_v48 = vsel %vm575_vm5, %v433_v37, %v607_v42  ;;  %v2434_v56 = vpop.f32.mrb[6].mxu1  ;;  %v621_v37 = vmul.f32 0.01, %v503_v29  ;;  %v620_v42 = vmul.f32 0.01, %v498_v32 }
  0xf4   : > { %v610_v50 = vmul.f32 0.01, %v448_v44  ;;  %1874 = vmatprep.mubr.f32.mxu1 %v639_v48  ;;  %vm578_vm8 = vcmp.gt.f32.partialorder %v448_v44, 0.0  ;;  %v2437_v59 = vpop.f32.mrb[7].mxu1  ;;  %v622_v48 = vmul.f32 0.01, %v508_v26 }
  0xf5   : > { %v609_v52 = vmul.f32 0.01, %v443_v47  ;;  %v1802_v53 = vpop.f32.mrb[8].mxu0  ;;  %1875 = vmatmul.mubr.f32.gmra.mrb[20].mxu1 %v640_v51  ;;  %vm577_vm7 = vcmp.gt.f32.partialorder %v443_v47, 0.0  ;;  %v653_v45 = vsel %vm589_vm2, %v503_v29, %v621_v37  ;;  %vm591_vm4 = vcmp.gt.f32.partialorder %v513_v39, 0.0 }
  0xf6   : > { %v458_v54 = vadd.f32 %v1802_v53, %v2411_v16  ;;  %v452_v55 = vpop.f32.mrb[9].mxu0  ;;  %v642_v61 = vsel %vm578_vm8, %v448_v44, %v610_v50  ;;  %v623_v44 = vmul.f32 0.01, %v513_v39  ;;  %v652_v50 = vsel %vm588_vm3, %v498_v32, %v620_v42 }
  0xf7   : > { %v453_v57 = vadd.f32 %v2411_v16, %v452_v55  ;;  %v641_v58 = vsel %vm577_vm7, %v443_v47, %v609_v52  ;;  %v2440_v2 = vpop.f32.mrb[8].mxu1  ;;  %v523_v47 = vadd.f32 %v2411_v16, %v2437_v59  ;;  %vm590_vm5 = vcmp.gt.f32.partialorder %v508_v26, 0.0 }
  0xf8   : > { %v612_v60 = vmul.f32 0.01, %v458_v54  ;;  %1877 = vmatprep.mubr.f32.mxu1 %v641_v58  ;;  %vm580_vm10 = vcmp.gt.f32.partialorder %v458_v54, 0.0  ;;  %v2443_v5 = vpop.f32.mrb[9].mxu1  ;;  %v655_v51 = vsel %vm591_vm4, %v513_v39, %v623_v44  ;;  %v624_v53 = vmul.f32 0.01, %v518_v49 }
  0xf9   : > { %v611_v62 = vmul.f32 0.01, %v453_v57  ;;  %v1805_v63 = vpop.f32.mrb[10].mxu0  ;;  %1878 = vmatmul.mubr.f32.gmra.mrb[22].mxu1 %v642_v61  ;;  %vm579_vm9 = vcmp.gt.f32.partialorder %v453_v57, 0.0  ;;  %v625_v36 = vmul.f32 0.01, %v523_v47  ;;  %v533_v52 = vadd.f32 %v2411_v16, %v2443_v5 }
  0xfa   : > { %v468_v0 = vadd.f32 %v1805_v63, %v2411_v16  ;;  %v462_v1 = vpop.f32.mrb[11].mxu0  ;;  %v644_v7 = vsel %vm580_vm10, %v458_v54, %v612_v60  ;;  %v528_v54 = vadd.f32 %v2434_v56, %v2411_v16  ;;  %v654_v55 = vsel %vm590_vm5, %v508_v26, %v622_v48 }
  0xfb   : > { %v463_v3 = vadd.f32 %v2411_v16, %v462_v1  ;;  %v643_v4 = vsel %vm579_vm9, %v453_v57, %v611_v62  ;;  %v2446_v12 = vpop.f32.mrb[10].mxu1  ;;  %vm593_vm6 = vcmp.gt.f32.partialorder %v523_v47, 0.0  ;;  %vm592_vm7 = vcmp.gt.f32.partialorder %v518_v49, 0.0 }
  0xfc   : > { %v614_v6 = vmul.f32 0.01, %v468_v0  ;;  %1880 = vmatprep.mubr.f32.mxu1 %v643_v4  ;;  %vm582_vm12 = vcmp.gt.f32.partialorder %v468_v0, 0.0  ;;  %v2451_v17 = vpop.f32.mrb[11].mxu1  ;;  %v627_v46 = vmul.f32 0.01, %v533_v52  ;;  %v657_v57 = vsel %vm593_vm6, %v523_v47, %v625_v36 }
  0xfd   : > { %v613_v8 = vmul.f32 0.01, %v463_v3  ;;  %v1808_v9 = vpop.f32.mrb[12].mxu0  ;;  %1881 = vmatmul.mubr.f32.gmra.mrb[24].mxu1 %v644_v7  ;;  %vm581_vm11 = vcmp.gt.f32.partialorder %v463_v3, 0.0  ;;  %v543_v58 = vadd.f32 %v2411_v16, %v2451_v17  ;;  %v626_v59 = vmul.f32 0.01, %v528_v54 }
  0xfe   : > { %v478_v10 = vadd.f32 %v1808_v9, %v2411_v16  ;;  %v472_v11 = vpop.f32.mrb[13].mxu0  ;;  %v646_v19 = vsel %vm582_vm12, %v468_v0, %v614_v6  ;;  %v538_v60 = vadd.f32 %v2440_v2, %v2411_v16  ;;  %v656_v61 = vsel %vm592_vm7, %v518_v49, %v624_v53 }
  0xff   : > { %v473_v13 = vadd.f32 %v2411_v16, %v472_v11  ;;  %v645_v14 = vsel %vm581_vm11, %v463_v3, %v613_v8  ;;  %v2454_v24 = vpop.f32.mrb[12].mxu1  ;;  %vm595_vm8 = vcmp.gt.f32.partialorder %v533_v52, 0.0  ;;  %vm594_vm9 = vcmp.gt.f32.partialorder %v528_v54, 0.0 }
 0x100   : > { %v616_v18 = vmul.f32 0.01, %v478_v10  ;;  %1883 = vmatprep.mubr.f32.mxu1 %v645_v14  ;;  %vm584_vm14 = vcmp.gt.f32.partialorder %v478_v10, 0.0  ;;  %v552_v30 = vpop.f32.mrb[13].mxu1  ;;  %v629_v56 = vmul.f32 0.01, %v543_v58  ;;  %v659_v62 = vsel %vm595_vm8, %v533_v52, %v627_v46 }
 0x101   : > { %v615_v20 = vmul.f32 0.01, %v473_v13  ;;  %v1811_v21 = vpop.f32.mrb[14].mxu0  ;;  %1884 = vmatmul.mubr.f32.gmra.mrb[26].mxu1 %v646_v19  ;;  %vm583_vm13 = vcmp.gt.f32.partialorder %v473_v13, 0.0  ;;  %v553_v63 = vadd.f32 %v2411_v16, %v552_v30  ;;  %v628_v0 = vmul.f32 0.01, %v538_v60 }
 0x102   : > { %v488_v22 = vadd.f32 %v1811_v21, %v2411_v16  ;;  %v482_v23 = vpop.f32.mrb[15].mxu0  ;;  %v648_v33 = vsel %vm584_vm14, %v478_v10, %v616_v18  ;;  %v548_v1 = vadd.f32 %v2446_v12, %v2411_v16  ;;  %v658_v3 = vsel %vm594_vm9, %v528_v54, %v626_v59  ;;  %v206_v19 = vld [vmem:[%s2716_s1 + $0x100] sm:$0xff] }
 0x103   : > { %v483_v25 = vadd.f32 %v2411_v16, %v482_v23  ;;  %v647_v28 = vsel %vm583_vm13, %v473_v13, %v615_v20  ;;  %v2461_v35 = vpop.f32.mrb[14].mxu1  ;;  %vm597_vm10 = vcmp.gt.f32.partialorder %v543_v58, 0.0  ;;  %vm596_vm11 = vcmp.gt.f32.partialorder %v538_v60, 0.0  ;;  %v2496_v21 = vld [vmem:[%s2717_s2 + $0x1] ss:$0 sm:$0xff] }
 0x104   : > { %v618_v31 = vmul.f32 0.01, %v488_v22  ;;  %1886 = vmatprep.mubr.f32.mxu1 %v647_v28  ;;  %vm586_vm1 = vcmp.gt.f32.partialorder %v488_v22, 0.0  ;;  %v562_v41 = vpop.f32.mrb[15].mxu1  ;;  %v631_v4 = vmul.f32 0.01, %v553_v63  ;;  %v661_v2 = vsel %vm597_vm10, %v543_v58, %v629_v56 }
 0x105   : > { %v617_v34 = vmul.f32 0.01, %v483_v25  ;;  %1887 = vmatmul.mubr.f32.gmra.mrb[28].mxu1 %v648_v33  ;;  %vm585_vm0 = vcmp.gt.f32.partialorder %v483_v25, 0.0  ;;  %v563_v5 = vadd.f32 %v2411_v16, %v562_v41  ;;  %v630_v6 = vmul.f32 0.01, %v548_v1 }
 0x106   : > { %v650_v43 = vsel %vm586_vm1, %v488_v22, %v618_v31  ;;  %v558_v7 = vadd.f32 %v2454_v24, %v2411_v16  ;;  %v660_v8 = vsel %vm596_vm11, %v538_v60, %v628_v0  ;;  %vm599_vm12 = vcmp.gt.f32.partialorder %v553_v63, 0.0 }
 0x107   : > { %v649_v38 = vsel %vm585_vm0, %v483_v25, %v617_v34  ;;  %vm598_vm13 = vcmp.gt.f32.partialorder %v548_v1, 0.0  ;;  %v633_v9 = vmul.f32 0.01, %v563_v5  ;;  %v663_v10 = vsel %vm599_vm12, %v553_v63, %v631_v4 }
 0x108   : > { %1889 = vmatprep.mubr.f32.mxu1 %v649_v38  ;;  %v632_v11 = vmul.f32 0.01, %v558_v7  ;;  %v568_v12 = vadd.f32 %v2461_v35, %v2411_v16  ;;  %v662_v13 = vsel %vm598_vm13, %v548_v1, %v630_v6  ;;  %vm601_vm14 = vcmp.gt.f32.partialorder %v563_v5, 0.0  ;;  %v207_v16 = vld [vmem:[%s2716_s1 + $0x108] sm:$0xff] }
 0x109   : > { %1890 = vmatmul.mubr.f32.gmra.mrb[30].mxu1 %v650_v43  ;;  %vm600_vm15 = vcmp.gt.f32.partialorder %v558_v7, 0.0  ;;  %v665_v14 = vsel %vm601_vm14, %v563_v5, %v633_v9  ;;  %v2060_v20 = vpack.c.bf16 %v207_v16, %v206_v19 }
 0x10a   : > { %1892 = vmatprep.mubr.f32.mxu1 %v651_v40  ;;  %v634_v15 = vmul.f32 0.01, %v568_v12  ;;  %v664_v17 = vsel %vm600_vm15, %v558_v7, %v632_v11  ;;  %vm602_vm0 = vcmp.gt.f32.partialorder %v568_v12, 0.0 }
 0x10b   : > { %2061 = vmatprep.subr.bf16.mxu0 %v2060_v20 }
 0x10c   : > { %v666_v18 = vsel %vm602_vm0, %v568_v12, %v634_v15  ;;  %2063 = vmatpush3.bf16.msra.mxu0 %v2060_v20 }
 0x10d   : > { %1893 = vmatmul.mubr.f32.gmra.mrb[32].mxu1 %v652_v50 }
 0x10e   : > { %1895 = vmatprep.mubr.f32.mxu1 %v653_v45 }
 0x111   : > { %1896 = vmatmul.mubr.f32.gmra.mrb[34].mxu1 %v654_v55 }
 0x112   : > { %1898 = vmatprep.mubr.f32.mxu1 %v655_v51 }
 0x115   : > { %1899 = vmatmul.mubr.f32.gmra.mrb[36].mxu1 %v656_v61 }
 0x116   : > { %1901 = vmatprep.mubr.f32.mxu1 %v657_v57 }
 0x119   : > { %1902 = vmatmul.mubr.f32.gmra.mrb[38].mxu1 %v658_v3 }
 0x11a   : > { %1904 = vmatprep.mubr.f32.mxu1 %v659_v62 }
 0x11d   : > { %1905 = vmatmul.mubr.f32.gmra.mrb[40].mxu1 %v660_v8 }
 0x11e   : > { %1907 = vmatprep.mubr.f32.mxu1 %v661_v2 }
 0x121   : > { %1908 = vmatmul.mubr.f32.gmra.mrb[42].mxu1 %v662_v13 }
 0x122   : > { %1910 = vmatprep.mubr.f32.mxu1 %v663_v10 }
 0x125   : > { %1911 = vmatmul.mubr.f32.gmra.mrb[44].mxu1 %v664_v17 }
 0x126   : > { %1913 = vmatprep.mubr.f32.mxu1 %v665_v14 }
 0x129   : > { %1914 = vmatmul.mubr.f32.gmra.mrb[46].mxu1 %v666_v18 }
 0x1c0   : > { %v1870_v22 = vpop.f32.mrb[16].mxu1 }
 0x1c1   : > { %v743_v23 = vadd.f32 %v1870_v22, %v2496_v21  ;;  %v737_v24 = vpop.f32.mrb[17].mxu1 }
 0x1c2   : > { %v738_v25 = vadd.f32 %v2496_v21, %v737_v24 }
 0x1c3   : > { %v929_v27 = vmul.f32 0.01, %v743_v23  ;;  %vm897_vm1 = vcmp.gt.f32.partialorder %v743_v23, 0.0 }
 0x1c4   : > { %v928_v28 = vmul.f32 0.01, %v738_v25  ;;  %v1873_v29 = vpop.f32.mrb[18].mxu1  ;;  %vm896_vm2 = vcmp.gt.f32.partialorder %v738_v25, 0.0 }
 0x1c5   : > { %v753_v30 = vadd.f32 %v1873_v29, %v2496_v21  ;;  %v747_v31 = vpop.f32.mrb[19].mxu1  ;;  %v961_v34 = vsel %vm897_vm1, %v743_v23, %v929_v27 }
 0x1c6   : > { %v748_v32 = vadd.f32 %v2496_v21, %v747_v31  ;;  %v960_v33 = vsel %vm896_vm2, %v738_v25, %v928_v28 }
 0x1c7   : > { %v931_v35 = vmul.f32 0.01, %v753_v30  ;;  %1948 = vmatprep.mubr.f32.mxu0 %v960_v33  ;;  %vm899_vm4 = vcmp.gt.f32.partialorder %v753_v30, 0.0 }
 0x1c8   : > { %v930_v37 = vmul.f32 0.01, %v748_v32  ;;  %v1876_v38 = vpop.f32.mrb[20].mxu1  ;;  %1949 = vmatmul.mubr.f32.vlgmr.msra.gmra.mrb[16].mxu0 %v961_v34  ;;  %vm898_vm3 = vcmp.gt.f32.partialorder %v748_v32, 0.0 }
 0x1c9   : > { %v763_v40 = vadd.f32 %v1876_v38, %v2496_v21  ;;  %v757_v39 = vpop.f32.mrb[21].mxu1  ;;  %v963_v43 = vsel %vm899_vm4, %v753_v30, %v931_v35 }
 0x1ca   : > { %v758_v41 = vadd.f32 %v2496_v21, %v757_v39  ;;  %v962_v42 = vsel %vm898_vm3, %v748_v32, %v930_v37 }
 0x1cb   : > { %v933_v26 = vmul.f32 0.01, %v763_v40  ;;  %1951 = vmatprep.mubr.f32.mxu0 %v962_v42  ;;  %vm901_vm6 = vcmp.gt.f32.partialorder %v763_v40, 0.0 }
 0x1cc   : > { %v932_v44 = vmul.f32 0.01, %v758_v41  ;;  %v1879_v45 = vpop.f32.mrb[22].mxu1  ;;  %1952 = vmatmul.mubr.f32.gmra.mrb[18].mxu0 %v963_v43  ;;  %vm900_vm5 = vcmp.gt.f32.partialorder %v758_v41, 0.0 }
 0x1cd   : > { %v773_v47 = vadd.f32 %v1879_v45, %v2496_v21  ;;  %v767_v48 = vpop.f32.mrb[23].mxu1  ;;  %v965_v51 = vsel %vm901_vm6, %v763_v40, %v933_v26 }
 0x1ce   : > { %v768_v49 = vadd.f32 %v2496_v21, %v767_v48  ;;  %v964_v50 = vsel %vm900_vm5, %v758_v41, %v932_v44 }
 0x1cf   : > { %v935_v36 = vmul.f32 0.01, %v773_v47  ;;  %1954 = vmatprep.mubr.f32.mxu0 %v964_v50  ;;  %vm903_vm8 = vcmp.gt.f32.partialorder %v773_v47, 0.0 }
 0x1d0   : > { %v934_v52 = vmul.f32 0.01, %v768_v49  ;;  %v1882_v53 = vpop.f32.mrb[24].mxu1  ;;  %1955 = vmatmul.mubr.f32.gmra.mrb[20].mxu0 %v965_v51  ;;  %vm902_vm7 = vcmp.gt.f32.partialorder %v768_v49, 0.0 }
 0x1d1   : > { %v783_v54 = vadd.f32 %v1882_v53, %v2496_v21  ;;  %v777_v55 = vpop.f32.mrb[25].mxu1  ;;  %v967_v59 = vsel %vm903_vm8, %v773_v47, %v935_v36 }
 0x1d2   : > { %v778_v46 = vadd.f32 %v2496_v21, %v777_v55  ;;  %v966_v57 = vsel %vm902_vm7, %v768_v49, %v934_v52 }
 0x1d3   : > { %v937_v58 = vmul.f32 0.01, %v783_v54  ;;  %1957 = vmatprep.mubr.f32.mxu0 %v966_v57  ;;  %vm905_vm10 = vcmp.gt.f32.partialorder %v783_v54, 0.0 }
 0x1d4   : > { %v936_v60 = vmul.f32 0.01, %v778_v46  ;;  %v1885_v61 = vpop.f32.mrb[26].mxu1  ;;  %1958 = vmatmul.mubr.f32.gmra.mrb[22].mxu0 %v967_v59  ;;  %vm904_vm9 = vcmp.gt.f32.partialorder %v778_v46, 0.0 }
 0x1d5   : > { %v793_v56 = vadd.f32 %v1885_v61, %v2496_v21  ;;  %v787_v62 = vpop.f32.mrb[27].mxu1  ;;  %v969_v3 = vsel %vm905_vm10, %v783_v54, %v937_v58 }
 0x1d6   : > { %v788_v63 = vadd.f32 %v2496_v21, %v787_v62  ;;  %v968_v0 = vsel %vm904_vm9, %v778_v46, %v936_v60 }
 0x1d7   : > { %v939_v1 = vmul.f32 0.01, %v793_v56  ;;  %1960 = vmatprep.mubr.f32.mxu0 %v968_v0  ;;  %vm907_vm12 = vcmp.gt.f32.partialorder %v793_v56, 0.0 }
 0x1d8   : > { %v938_v4 = vmul.f32 0.01, %v788_v63  ;;  %v1888_v2 = vpop.f32.mrb[28].mxu1  ;;  %1961 = vmatmul.mubr.f32.gmra.mrb[24].mxu0 %v969_v3  ;;  %vm906_vm11 = vcmp.gt.f32.partialorder %v788_v63, 0.0 }
 0x1d9   : > { %v803_v5 = vadd.f32 %v1888_v2, %v2496_v21  ;;  %v797_v6 = vpop.f32.mrb[29].mxu1  ;;  %v971_v10 = vsel %vm907_vm12, %v793_v56, %v939_v1 }
 0x1da   : > { %v798_v7 = vadd.f32 %v2496_v21, %v797_v6  ;;  %v970_v8 = vsel %vm906_vm11, %v788_v63, %v938_v4 }
 0x1db   : > { %v941_v9 = vmul.f32 0.01, %v803_v5  ;;  %1963 = vmatprep.mubr.f32.mxu0 %v970_v8  ;;  %vm909_vm14 = vcmp.gt.f32.partialorder %v803_v5, 0.0 }
 0x1dc   : > { %v940_v11 = vmul.f32 0.01, %v798_v7  ;;  %v1891_v12 = vpop.f32.mrb[30].mxu1  ;;  %1964 = vmatmul.mubr.f32.gmra.mrb[26].mxu0 %v971_v10  ;;  %vm908_vm13 = vcmp.gt.f32.partialorder %v798_v7, 0.0 }
 0x1dd   : > { %v813_v13 = vadd.f32 %v1891_v12, %v2496_v21  ;;  %v807_v14 = vpop.f32.mrb[31].mxu1  ;;  %v973_v19 = vsel %vm909_vm14, %v803_v5, %v941_v9 }
 0x1de   : > { %v808_v15 = vadd.f32 %v2496_v21, %v807_v14  ;;  %v972_v17 = vsel %vm908_vm13, %v798_v7, %v940_v11 }
 0x1df   : > { %v943_v18 = vmul.f32 0.01, %v813_v13  ;;  %1966 = vmatprep.mubr.f32.mxu0 %v972_v17  ;;  %vm911_vm0 = vcmp.gt.f32.partialorder %v813_v13, 0.0 }
 0x1e0   : > { %v942_v16 = vmul.f32 0.01, %v808_v15  ;;  %v1894_v20 = vpop.f32.mrb[32].mxu1  ;;  %1967 = vmatmul.mubr.f32.gmra.mrb[28].mxu0 %v973_v19  ;;  %vm910_vm15 = vcmp.gt.f32.partialorder %v808_v15, 0.0 }
 0x1e1   : > { %v823_v22 = vadd.f32 %v1894_v20, %v2496_v21  ;;  %v817_v23 = vpop.f32.mrb[33].mxu1  ;;  %v975_v28 = vsel %vm911_vm0, %v813_v13, %v943_v18 }
 0x1e2   : > { %v818_v24 = vadd.f32 %v2496_v21, %v817_v23  ;;  %v974_v25 = vsel %vm910_vm15, %v808_v15, %v942_v16 }
 0x1e3   : > { %v945_v27 = vmul.f32 0.01, %v823_v22  ;;  %1969 = vmatprep.mubr.f32.mxu0 %v974_v25  ;;  %vm913_vm2 = vcmp.gt.f32.partialorder %v823_v22, 0.0 }
 0x1e4   : > { %v944_v29 = vmul.f32 0.01, %v818_v24  ;;  %v1897_v30 = vpop.f32.mrb[34].mxu1  ;;  %1970 = vmatmul.mubr.f32.gmra.mrb[30].mxu0 %v975_v28  ;;  %vm912_vm1 = vcmp.gt.f32.partialorder %v818_v24, 0.0 }
 0x1e5   : > { %v833_v31 = vadd.f32 %v1897_v30, %v2496_v21  ;;  %v827_v32 = vpop.f32.mrb[35].mxu1  ;;  %v977_v37 = vsel %vm913_vm2, %v823_v22, %v945_v27 }
 0x1e6   : > { %v828_v33 = vadd.f32 %v2496_v21, %v827_v32  ;;  %v976_v34 = vsel %vm912_vm1, %v818_v24, %v944_v29  ;;  %v2533_v24 = vld [vmem:[%s2717_s2 + $0x2] ss:$0 sm:$0xff]  ;;  %vm1485_vm1 = vcmask 293888  }
 0x1e7   : > { %v947_v35 = vmul.f32 0.01, %v833_v31  ;;  %1972 = vmatprep.mubr.f32.mxu0 %v976_v34  ;;  %vm915_vm4 = vcmp.gt.f32.partialorder %v833_v31, 0.0 }
 0x1e8   : > { %v946_v38 = vmul.f32 0.01, %v828_v33  ;;  %v1900_v40 = vpop.f32.mrb[36].mxu1  ;;  %1973 = vmatmul.mubr.f32.gmra.mrb[32].mxu0 %v977_v37  ;;  %vm914_vm3 = vcmp.gt.f32.partialorder %v828_v33, 0.0 }
 0x1e9   : > { %v843_v39 = vadd.f32 %v1900_v40, %v2496_v21  ;;  %v837_v41 = vpop.f32.mrb[37].mxu1  ;;  %v979_v44 = vsel %vm915_vm4, %v833_v31, %v947_v35 }
 0x1ea   : > { %v838_v42 = vadd.f32 %v2496_v21, %v837_v41  ;;  %v978_v26 = vsel %vm914_vm3, %v828_v33, %v946_v38 }
 0x1eb   : > { %v949_v43 = vmul.f32 0.01, %v843_v39  ;;  %1975 = vmatprep.mubr.f32.mxu0 %v978_v26  ;;  %vm917_vm6 = vcmp.gt.f32.partialorder %v843_v39, 0.0 }
 0x1ec   : > { %v948_v45 = vmul.f32 0.01, %v838_v42  ;;  %v1903_v47 = vpop.f32.mrb[38].mxu1  ;;  %1976 = vmatmul.mubr.f32.gmra.mrb[34].mxu0 %v979_v44  ;;  %vm916_vm5 = vcmp.gt.f32.partialorder %v838_v42, 0.0 }
 0x1ed   : > { %v853_v48 = vadd.f32 %v1903_v47, %v2496_v21  ;;  %v847_v49 = vpop.f32.mrb[39].mxu1  ;;  %v981_v52 = vsel %vm917_vm6, %v843_v39, %v949_v43 }
 0x1ee   : > { %v848_v50 = vadd.f32 %v2496_v21, %v847_v49  ;;  %v980_v36 = vsel %vm916_vm5, %v838_v42, %v948_v45 }
 0x1ef   : > { %v951_v51 = vmul.f32 0.01, %v853_v48  ;;  %1978 = vmatprep.mubr.f32.mxu0 %v980_v36  ;;  %vm919_vm8 = vcmp.gt.f32.partialorder %v853_v48, 0.0 }
 0x1f0   : > { %v950_v53 = vmul.f32 0.01, %v848_v50  ;;  %v1906_v54 = vpop.f32.mrb[40].mxu1  ;;  %1979 = vmatmul.mubr.f32.gmra.mrb[36].mxu0 %v981_v52  ;;  %vm918_vm7 = vcmp.gt.f32.partialorder %v848_v50, 0.0 }
 0x1f1   : > { %v863_v55 = vadd.f32 %v1906_v54, %v2496_v21  ;;  %v857_v46 = vpop.f32.mrb[41].mxu1  ;;  %v983_v60 = vsel %vm919_vm8, %v853_v48, %v951_v51 }
 0x1f2   : > { %v858_v57 = vadd.f32 %v2496_v21, %v857_v46  ;;  %v982_v58 = vsel %vm918_vm7, %v848_v50, %v950_v53 }
 0x1f3   : > { %v953_v59 = vmul.f32 0.01, %v863_v55  ;;  %1981 = vmatprep.mubr.f32.mxu0 %v982_v58  ;;  %vm921_vm10 = vcmp.gt.f32.partialorder %v863_v55, 0.0 }
 0x1f4   : > { %v952_v61 = vmul.f32 0.01, %v858_v57  ;;  %v1909_v56 = vpop.f32.mrb[42].mxu1  ;;  %1982 = vmatmul.mubr.f32.gmra.mrb[38].mxu0 %v983_v60  ;;  %vm920_vm9 = vcmp.gt.f32.partialorder %v858_v57, 0.0 }
 0x1f5   : > { %v873_v62 = vadd.f32 %v1909_v56, %v2496_v21  ;;  %v867_v63 = vpop.f32.mrb[43].mxu1  ;;  %v985_v4 = vsel %vm921_vm10, %v863_v55, %v953_v59 }
 0x1f6   : > { %v868_v0 = vadd.f32 %v2496_v21, %v867_v63  ;;  %v984_v1 = vsel %vm920_vm9, %v858_v57, %v952_v61 }
 0x1f7   : > { %v955_v3 = vmul.f32 0.01, %v873_v62  ;;  %1984 = vmatprep.mubr.f32.mxu0 %v984_v1  ;;  %vm923_vm12 = vcmp.gt.f32.partialorder %v873_v62, 0.0 }
 0x1f8   : > { %v954_v2 = vmul.f32 0.01, %v868_v0  ;;  %v1912_v5 = vpop.f32.mrb[44].mxu1  ;;  %1985 = vmatmul.mubr.f32.gmra.mrb[40].mxu0 %v985_v4  ;;  %vm922_vm11 = vcmp.gt.f32.partialorder %v868_v0, 0.0 }
 0x1f9   : > { %v883_v6 = vadd.f32 %v1912_v5, %v2496_v21  ;;  %v877_v7 = vpop.f32.mrb[45].mxu1  ;;  %v987_v11 = vsel %vm923_vm12, %v873_v62, %v955_v3 }
 0x1fa   : > { %v878_v8 = vadd.f32 %v2496_v21, %v877_v7  ;;  %v986_v9 = vsel %vm922_vm11, %v868_v0, %v954_v2 }
 0x1fb   : > { %v957_v10 = vmul.f32 0.01, %v883_v6  ;;  %1987 = vmatprep.mubr.f32.mxu0 %v986_v9  ;;  %vm925_vm14 = vcmp.gt.f32.partialorder %v883_v6, 0.0 }
 0x1fc   : > { %v956_v12 = vmul.f32 0.01, %v878_v8  ;;  %v1915_v13 = vpop.f32.mrb[46].mxu1  ;;  %1988 = vmatmul.mubr.f32.gmra.mrb[42].mxu0 %v987_v11  ;;  %vm924_vm13 = vcmp.gt.f32.partialorder %v878_v8, 0.0  ;;  %v2551_v11 = vld [vmem:[%s2717_s2 + $0x4] ss:$0 sm:$0xff] }
 0x1fd   : > { %v893_v14 = vadd.f32 %v1915_v13, %v2496_v21  ;;  %v887_v15 = vpop.f32.mrb[47].mxu1  ;;  %v989_v16 = vsel %vm925_vm14, %v883_v6, %v957_v10 }
 0x1fe   : > { %v888_v17 = vadd.f32 %v2496_v21, %v887_v15  ;;  %v988_v18 = vsel %vm924_vm13, %v878_v8, %v956_v12 }
 0x1ff   : > { %v959_v19 = vmul.f32 0.01, %v893_v14  ;;  %1990 = vmatprep.mubr.f32.mxu0 %v988_v18  ;;  %vm927_vm0 = vcmp.gt.f32.partialorder %v893_v14, 0.0 }
 0x200   : > { %v958_v20 = vmul.f32 0.01, %v888_v17  ;;  %1991 = vmatmul.mubr.f32.gmra.mrb[44].mxu0 %v989_v16  ;;  %vm926_vm15 = vcmp.gt.f32.partialorder %v888_v17, 0.0 }
 0x201   : > { %v991_v23 = vsel %vm927_vm0, %v893_v14, %v959_v19 }
 0x202   : > { %v990_v22 = vsel %vm926_vm15, %v888_v17, %v958_v20  ;;  %v2557_v17 = vld [vmem:[%s2717_s2 + $0x3] ss:$0 sm:$0xff] }
 0x203   : > { %1993 = vmatprep.mubr.f32.mxu0 %v990_v22 }
 0x204   : > { %1994 = vmatmul.mubr.f32.gmra.mrb[46].mxu0 %v991_v23 }
 0x29b   : > { %v1950_v25 = vpop.f32.mrb[16].mxu0 }
 0x29c   : > { %v1068_v21 = vadd.f32 %v1950_v25, %v2533_v24  ;;  %v1062_v27 = vpop.f32.mrb[17].mxu0 }
 0x29d   : > { %v1063_v28 = vadd.f32 %v2533_v24, %v1062_v27 }
 0x29e   : > { %v1619_v29 = vmul.f32 -1.442695, %v1068_v21 }
 0x29f   : > { %v1618_v30 = vmul.f32 -1.442695, %v1063_v28  ;;  %v1953_v31 = vpop.f32.mrb[18].mxu0 }
 0x2a0   : > { %2074 = vpow2.f32 %v1619_v29  ;;  %v1078_v32 = vadd.f32 %v1953_v31, %v2533_v24  ;;  %v1072_v33 = vpop.f32.mrb[19].mxu0 }
 0x2a1   : > { %2076 = vpow2.f32 %v1618_v30  ;;  %v1073_v34 = vadd.f32 %v2533_v24, %v1072_v33 }
 0x2a2   : > { %v1621_v35 = vmul.f32 -1.442695, %v1078_v32 }
 0x2a3   : > { %v1620_v37 = vmul.f32 -1.442695, %v1073_v34  ;;  %v1956_v38 = vpop.f32.mrb[20].mxu0 }
 0x2a4   : > { %2078 = vpow2.f32 %v1621_v35  ;;  %v1088_v40 = vadd.f32 %v1956_v38, %v2533_v24  ;;  %v1082_v39 = vpop.f32.mrb[21].mxu0 }
 0x2a5   : > { %2080 = vpow2.f32 %v1620_v37  ;;  %v1083_v41 = vadd.f32 %v2533_v24, %v1082_v39 }
 0x2a6   : > { %v1623_v42 = vmul.f32 -1.442695, %v1088_v40 }
 0x2a7   : > { %v1622_v26 = vmul.f32 -1.442695, %v1083_v41  ;;  %v1959_v43 = vpop.f32.mrb[22].mxu0 }
 0x2a8   : > { %2082 = vpow2.f32 %v1623_v42  ;;  %v1098_v44 = vadd.f32 %v1959_v43, %v2533_v24  ;;  %v1092_v45 = vpop.f32.mrb[23].mxu0 }
 0x2a9   : > { %2084 = vpow2.f32 %v1622_v26  ;;  %v1093_v47 = vadd.f32 %v2533_v24, %v1092_v45 }
 0x2aa   : > { %v2075_v48 = vpop.eup %2074  ;;  %v1625_v49 = vmul.f32 -1.442695, %v1098_v44 }
 0x2ab   : > { %v2077_v50 = vpop.eup %2076  ;;  %v1318_v36 = vadd.f32 1.0, %v2075_v48  ;;  %v1624_v51 = vmul.f32 -1.442695, %v1093_v47  ;;  %v1962_v52 = vpop.f32.mrb[24].mxu0 }
 0x2ac   : > { %v1317_v53 = vadd.f32 1.0, %v2077_v50  ;;  %2086 = vpow2.f32 %v1625_v49  ;;  %v1108_v54 = vadd.f32 %v1962_v52, %v2533_v24  ;;  %v1102_v55 = vpop.f32.mrb[25].mxu0 }
 0x2ad   : > { %2088 = vrcp.f32 %v1318_v36  ;;  %v1103_v46 = vadd.f32 %v2533_v24, %v1102_v55 }
 0x2ae   : > { %v2079_v57 = vpop.eup %2078  ;;  %2090 = vrcp.f32 %v1317_v53  ;;  %v1627_v58 = vmul.f32 -1.442695, %v1108_v54 }
 0x2af   : > { %v2081_v59 = vpop.eup %2080  ;;  %v1320_v60 = vadd.f32 1.0, %v2079_v57  ;;  %2092 = vpow2.f32 %v1624_v51  ;;  %v1626_v61 = vmul.f32 -1.442695, %v1103_v46  ;;  %v1965_v56 = vpop.f32.mrb[26].mxu0 }
 0x2b0   : > { %v1319_v62 = vadd.f32 1.0, %v2081_v59  ;;  %2094 = vpow2.f32 %v1627_v58  ;;  %v1118_v63 = vadd.f32 %v1965_v56, %v2533_v24  ;;  %v1112_v0 = vpop.f32.mrb[27].mxu0 }
 0x2b1   : > { %2096 = vrcp.f32 %v1320_v60  ;;  %v1113_v1 = vadd.f32 %v2533_v24, %v1112_v0 }
 0x2b2   : > { %v2083_v3 = vpop.eup %2082  ;;  %2098 = vrcp.f32 %v1319_v62  ;;  %v1629_v4 = vmul.f32 -1.442695, %v1118_v63 }
 0x2b3   : > { %v2085_v2 = vpop.eup %2084  ;;  %v1322_v5 = vadd.f32 1.0, %v2083_v3  ;;  %2100 = vpow2.f32 %v1626_v61  ;;  %v1628_v6 = vmul.f32 -1.442695, %v1113_v1  ;;  %v1968_v7 = vpop.f32.mrb[28].mxu0 }
 0x2b4   : > { %v1321_v8 = vadd.f32 1.0, %v2085_v2  ;;  %2102 = vpow2.f32 %v1629_v4  ;;  %v1128_v9 = vadd.f32 %v1968_v7, %v2533_v24  ;;  %v1122_v10 = vpop.f32.mrb[29].mxu0 }
 0x2b5   : > { %2104 = vrcp.f32 %v1322_v5  ;;  %v1123_v12 = vadd.f32 %v2533_v24, %v1122_v10 }
 0x2b6   : > { %v2087_v13 = vpop.eup %2086  ;;  %2106 = vrcp.f32 %v1321_v8  ;;  %v1631_v14 = vmul.f32 -1.442695, %v1128_v9 }
 0x2b7   : > { %v2089_v15 = vpop.eup %2088  ;;  %v1324_v18 = vadd.f32 1.0, %v2087_v13  ;;  %2108 = vpow2.f32 %v1628_v6  ;;  %v1630_v19 = vmul.f32 -1.442695, %v1123_v12  ;;  %v1971_v16 = vpop.f32.mrb[30].mxu0 }
 0x2b8   : > { %v2091_v20 = vpop.eup %2090  ;;  %v1418_v22 = vmul.f32 %v2089_v15, %v2551_v11  ;;  %2110 = vpow2.f32 %v1631_v14  ;;  %v1138_v23 = vadd.f32 %v1971_v16, %v2533_v24  ;;  %v1132_v25 = vpop.f32.mrb[31].mxu0 }
 0x2b9   : > { %v2093_v21 = vpop.eup %2092  ;;  %v1417_v27 = vmul.f32 %v2091_v20, %v2551_v11  ;;  %2112 = vrcp.f32 %v1324_v18  ;;  %v1133_v28 = vadd.f32 %v2533_v24, %v1132_v25 }
 0x2ba   : > { %v2095_v29 = vpop.eup %2094  ;;  %v1454_v30 = vadd.f32 %v2557_v17, %v1418_v22  ;;  %v1323_v31 = vadd.f32 1.0, %v2093_v21  ;;  %2114 = vpow2.f32 %v1630_v19  ;;  %v1633_v32 = vmul.f32 -1.442695, %v1138_v23 }
 0x2bb   : > { %v2097_v33 = vpop.eup %2096  ;;  %v1453_v34 = vadd.f32 %v2557_v17, %v1417_v27  ;;  %v1326_v35 = vadd.f32 1.0, %v2095_v29  ;;  %v1632_v37 = vmul.f32 -1.442695, %v1133_v28  ;;  %v1974_v38 = vpop.f32.mrb[32].mxu0 }
 0x2bc   : > { %v2099_v40 = vpop.eup %2098  ;;  %1487 = vst.msk [vmem:[%s2566_s28 + $0x8] sm:$0xff] %vm1485_vm1, %v1454_v30  ;;  %v1420_v39 = vmul.f32 %v2097_v33, %v2551_v11  ;;  %2116 = vrcp.f32 %v1323_v31  ;;  %v1148_v41 = vadd.f32 %v1974_v38, %v2533_v24  ;;  %v1142_v42 = vpop.f32.mrb[33].mxu0 }
 0x2bd   : > { %v2101_v26 = vpop.eup %2100  ;;  %1486 = vst.msk [vmem:[%s2566_s28] sm:$0xff] %vm1485_vm1, %v1453_v34  ;;  %v1419_v43 = vmul.f32 %v2099_v40, %v2551_v11  ;;  %2118 = vrcp.f32 %v1326_v35  ;;  %v1143_v44 = vadd.f32 %v2533_v24, %v1142_v42 }
 0x2be   : > { %v2103_v45 = vpop.eup %2102  ;;  %v1456_v47 = vadd.f32 %v2557_v17, %v1420_v39  ;;  %v1325_v48 = vadd.f32 1.0, %v2101_v26  ;;  %2120 = vpow2.f32 %v1633_v32  ;;  %v1635_v49 = vmul.f32 -1.442695, %v1148_v41 }
 0x2bf   : > { %v2105_v50 = vpop.eup %2104  ;;  %v1455_v36 = vadd.f32 %v2557_v17, %v1419_v43  ;;  %v1328_v51 = vadd.f32 1.0, %v2103_v45  ;;  %2122 = vpow2.f32 %v1632_v37  ;;  %v1634_v52 = vmul.f32 -1.442695, %v1143_v44  ;;  %v1977_v53 = vpop.f32.mrb[34].mxu0 }
 0x2c0   : > { %v2107_v54 = vpop.eup %2106  ;;  %1489 = vst.msk [vmem:[%s2566_s28 + $0x18] sm:$0xff] %vm1485_vm1, %v1456_v47  ;;  %v1422_v55 = vmul.f32 %v2105_v50, %v2551_v11  ;;  %2124 = vrcp.f32 %v1325_v48  ;;  %v1158_v46 = vadd.f32 %v1977_v53, %v2533_v24  ;;  %v1152_v57 = vpop.f32.mrb[35].mxu0 }
 0x2c1   : > { %v2109_v58 = vpop.eup %2108  ;;  %1488 = vst.msk [vmem:[%s2566_s28 + $0x10] sm:$0xff] %vm1485_vm1, %v1455_v36  ;;  %v1421_v59 = vmul.f32 %v2107_v54, %v2551_v11  ;;  %2126 = vrcp.f32 %v1328_v51  ;;  %v1153_v60 = vadd.f32 %v2533_v24, %v1152_v57 }
 0x2c2   : > { %v2111_v61 = vpop.eup %2110  ;;  %v1458_v56 = vadd.f32 %v2557_v17, %v1422_v55  ;;  %v1327_v62 = vadd.f32 1.0, %v2109_v58  ;;  %2128 = vpow2.f32 %v1635_v49  ;;  %v1637_v63 = vmul.f32 -1.442695, %v1158_v46 }
 0x2c3   : > { %v2113_v0 = vpop.eup %2112  ;;  %v1457_v1 = vadd.f32 %v2557_v17, %v1421_v59  ;;  %v1330_v3 = vadd.f32 1.0, %v2111_v61  ;;  %2130 = vpow2.f32 %v1634_v52  ;;  %v1980_v4 = vpop.f32.mrb[36].mxu0  ;;  %v1636_v6 = vmul.f32 -1.442695, %v1153_v60 }
 0x2c4   : > { %v2115_v2 = vpop.eup %2114  ;;  %1491 = vst.msk [vmem:[%s2566_s28 + $0x28] sm:$0xff] %vm1485_vm1, %v1458_v56  ;;  %v1424_v5 = vmul.f32 %v2113_v0, %v2551_v11  ;;  %2132 = vrcp.f32 %v1327_v62  ;;  %v1168_v7 = vadd.f32 %v1980_v4, %v2533_v24  ;;  %v1162_v8 = vpop.f32.mrb[37].mxu0 }
 0x2c5   : > { %1490 = vst.msk [vmem:[%s2566_s28 + $0x20] sm:$0xff] %vm1485_vm1, %v1457_v1  ;;  %2134 = vrcp.f32 %v1330_v3  ;;  %v1329_v9 = vadd.f32 1.0, %v2115_v2  ;;  %v1163_v10 = vadd.f32 %v2533_v24, %v1162_v8 }
 0x2c6   : > { %v2117_v12 = vpop.eup %2116  ;;  %v1460_v13 = vadd.f32 %v2557_v17, %v1424_v5  ;;  %2136 = vpow2.f32 %v1637_v63  ;;  %v1639_v14 = vmul.f32 -1.442695, %v1168_v7 }
 0x2c7   : > { %v2119_v15 = vpop.eup %2118  ;;  %v1423_v18 = vmul.f32 %v2117_v12, %v2551_v11  ;;  %2138 = vrcp.f32 %v1329_v9  ;;  %v1638_v19 = vmul.f32 -1.442695, %v1163_v10  ;;  %v1983_v16 = vpop.f32.mrb[38].mxu0 }
 0x2c8   : > { %v2121_v20 = vpop.eup %2120  ;;  %1493 = vst.msk [vmem:[%s2566_s28 + $0x38] sm:$0xff] %vm1485_vm1, %v1460_v13  ;;  %v1426_v22 = vmul.f32 %v2119_v15, %v2551_v11  ;;  %2140 = vpow2.f32 %v1636_v6  ;;  %v1178_v23 = vadd.f32 %v1983_v16, %v2533_v24  ;;  %v1172_v25 = vpop.f32.mrb[39].mxu0 }
 0x2c9   : > { %v2123_v21 = vpop.eup %2122  ;;  %v1459_v27 = vadd.f32 %v2557_v17, %v1423_v18  ;;  %v1332_v28 = vadd.f32 1.0, %v2121_v20  ;;  %2142 = vpow2.f32 %v1639_v14  ;;  %v1173_v29 = vadd.f32 %v2533_v24, %v1172_v25 }
 0x2ca   : > { %v2125_v30 = vpop.eup %2124  ;;  %v1462_v31 = vadd.f32 %v2557_v17, %v1426_v22  ;;  %v1331_v32 = vadd.f32 1.0, %v2123_v21  ;;  %2144 = vpow2.f32 %v1638_v19  ;;  %v1641_v33 = vmul.f32 -1.442695, %v1178_v23 }
 0x2cb   : > { %v2127_v34 = vpop.eup %2126  ;;  %1492 = vst.msk [vmem:[%s2566_s28 + $0x30] sm:$0xff] %vm1485_vm1, %v1459_v27  ;;  %v1425_v35 = vmul.f32 %v2125_v30, %v2551_v11  ;;  %2146 = vrcp.f32 %v1332_v28  ;;  %v1640_v37 = vmul.f32 -1.442695, %v1173_v29  ;;  %v1986_v38 = vpop.f32.mrb[40].mxu0 }
 0x2cc   : > { %v2129_v40 = vpop.eup %2128  ;;  %1495 = vst.msk [vmem:[%s2566_s28 + $0x48] sm:$0xff] %vm1485_vm1, %v1462_v31  ;;  %v1428_v39 = vmul.f32 %v2127_v34, %v2551_v11  ;;  %2148 = vrcp.f32 %v1331_v32  ;;  %v1188_v41 = vadd.f32 %v1986_v38, %v2533_v24  ;;  %v1182_v42 = vpop.f32.mrb[41].mxu0 }
 0x2cd   : > { %v2131_v26 = vpop.eup %2130  ;;  %v1461_v43 = vadd.f32 %v2557_v17, %v1425_v35  ;;  %v1334_v44 = vadd.f32 1.0, %v2129_v40  ;;  %2150 = vpow2.f32 %v1641_v33  ;;  %v1183_v45 = vadd.f32 %v2533_v24, %v1182_v42 }
 0x2ce   : > { %v2133_v47 = vpop.eup %2132  ;;  %v1464_v48 = vadd.f32 %v2557_v17, %v1428_v39  ;;  %v1333_v49 = vadd.f32 1.0, %v2131_v26  ;;  %2152 = vpow2.f32 %v1640_v37  ;;  %v1643_v50 = vmul.f32 -1.442695, %v1188_v41 }
 0x2cf   : > { %v2135_v36 = vpop.eup %2134  ;;  %1494 = vst.msk [vmem:[%s2566_s28 + $0x40] sm:$0xff] %vm1485_vm1, %v1461_v43  ;;  %v1427_v51 = vmul.f32 %v2133_v47, %v2551_v11  ;;  %2154 = vrcp.f32 %v1334_v44  ;;  %v1642_v52 = vmul.f32 -1.442695, %v1183_v45  ;;  %v1989_v53 = vpop.f32.mrb[42].mxu0 }
 0x2d0   : > { %v2137_v54 = vpop.eup %2136  ;;  %1497 = vst.msk [vmem:[%s2566_s28 + $0x58] sm:$0xff] %vm1485_vm1, %v1464_v48  ;;  %v1430_v55 = vmul.f32 %v2135_v36, %v2551_v11  ;;  %2156 = vrcp.f32 %v1333_v49  ;;  %v1198_v46 = vadd.f32 %v1989_v53, %v2533_v24  ;;  %v1192_v57 = vpop.f32.mrb[43].mxu0 }
 0x2d1   : > { %v2139_v58 = vpop.eup %2138  ;;  %v1463_v59 = vadd.f32 %v2557_v17, %v1427_v51  ;;  %v1336_v60 = vadd.f32 1.0, %v2137_v54  ;;  %2158 = vpow2.f32 %v1643_v50  ;;  %v1193_v61 = vadd.f32 %v2533_v24, %v1192_v57 }
 0x2d2   : > { %v2141_v56 = vpop.eup %2140  ;;  %v1466_v62 = vadd.f32 %v2557_v17, %v1430_v55  ;;  %v1429_v63 = vmul.f32 %v2139_v58, %v2551_v11  ;;  %2160 = vpow2.f32 %v1642_v52  ;;  %v1645_v0 = vmul.f32 -1.442695, %v1198_v46 }
 0x2d3   : > { %v2143_v1 = vpop.eup %2142  ;;  %1496 = vst.msk [vmem:[%s2566_s28 + $0x50] sm:$0xff] %vm1485_vm1, %v1463_v59  ;;  %2162 = vrcp.f32 %v1336_v60  ;;  %v1335_v3 = vadd.f32 1.0, %v2141_v56  ;;  %v1644_v4 = vmul.f32 -1.442695, %v1193_v61  ;;  %v1992_v2 = vpop.f32.mrb[44].mxu0 }
 0x2d4   : > { %v2145_v5 = vpop.eup %2144  ;;  %1499 = vst.msk [vmem:[%s2566_s28 + $0x68] sm:$0xff] %vm1485_vm1, %v1466_v62  ;;  %v1465_v6 = vadd.f32 %v2557_v17, %v1429_v63  ;;  %v1338_v7 = vadd.f32 1.0, %v2143_v1  ;;  %2164 = vpow2.f32 %v1645_v0  ;;  %v1208_v8 = vadd.f32 %v1992_v2, %v2533_v24  ;;  %v1202_v9 = vpop.f32.mrb[45].mxu0 }
 0x2d5   : > { %v2147_v10 = vpop.eup %2146  ;;  %2166 = vrcp.f32 %v1335_v3  ;;  %v1337_v12 = vadd.f32 1.0, %v2145_v5  ;;  %v1203_v13 = vadd.f32 %v2533_v24, %v1202_v9 }
 0x2d6   : > { %v2149_v14 = vpop.eup %2148  ;;  %1498 = vst.msk [vmem:[%s2566_s28 + $0x60] sm:$0xff] %vm1485_vm1, %v1465_v6  ;;  %v1432_v15 = vmul.f32 %v2147_v10, %v2551_v11  ;;  %2168 = vrcp.f32 %v1338_v7  ;;  %v1647_v18 = vmul.f32 -1.442695, %v1208_v8 }
 0x2d7   : > { %v2151_v19 = vpop.eup %2150  ;;  %v1431_v16 = vmul.f32 %v2149_v14, %v2551_v11  ;;  %2170 = vrcp.f32 %v1337_v12  ;;  %v1646_v20 = vmul.f32 -1.442695, %v1203_v13  ;;  %v1995_v22 = vpop.f32.mrb[46].mxu0 }
 0x2d8   : > { %v2153_v23 = vpop.eup %2152  ;;  %v1468_v25 = vadd.f32 %v2557_v17, %v1432_v15  ;;  %v1340_v21 = vadd.f32 1.0, %v2151_v19  ;;  %2172 = vpow2.f32 %v1644_v4  ;;  %v1218_v27 = vadd.f32 %v1995_v22, %v2533_v24  ;;  %v1212_v28 = vpop.f32.mrb[47].mxu0 }
 0x2d9   : > { %v2155_v29 = vpop.eup %2154  ;;  %v1467_v30 = vadd.f32 %v2557_v17, %v1431_v16  ;;  %v1339_v31 = vadd.f32 1.0, %v2153_v23  ;;  %2174 = vpow2.f32 %v1647_v18  ;;  %v1213_v32 = vadd.f32 %v2533_v24, %v1212_v28 }
 0x2da   : > { %v2157_v33 = vpop.eup %2156  ;;  %1501 = vst.msk [vmem:[%s2566_s28 + $0x78] sm:$0xff] %vm1485_vm1, %v1468_v25  ;;  %v1434_v34 = vmul.f32 %v2155_v29, %v2551_v11  ;;  %2176 = vrcp.f32 %v1340_v21  ;;  %v1649_v35 = vmul.f32 -1.442695, %v1218_v27 }
 0x2db   : > { %v2159_v37 = vpop.eup %2158  ;;  %1500 = vst.msk [vmem:[%s2566_s28 + $0x70] sm:$0xff] %vm1485_vm1, %v1467_v30  ;;  %v1433_v38 = vmul.f32 %v2157_v33, %v2551_v11  ;;  %2178 = vrcp.f32 %v1339_v31  ;;  %v1648_v24 = vmul.f32 -1.442695, %v1213_v32 }
 0x2dc   : > { %v2161_v40 = vpop.eup %2160  ;;  %v1470_v39 = vadd.f32 %v2557_v17, %v1434_v34  ;;  %v1342_v41 = vadd.f32 1.0, %v2159_v37  ;;  %2180 = vpow2.f32 %v1646_v20 }
 0x2dd   : > { %v2163_v42 = vpop.eup %2162  ;;  %v1469_v26 = vadd.f32 %v2557_v17, %v1433_v38  ;;  %v1341_v43 = vadd.f32 1.0, %v2161_v40  ;;  %2182 = vpow2.f32 %v1649_v35 }
 0x2de   : > { %v2165_v44 = vpop.eup %2164  ;;  %1503 = vst.msk [vmem:[%s2566_s28 + $0x88] sm:$0xff] %vm1485_vm1, %v1470_v39  ;;  %v1436_v45 = vmul.f32 %v2163_v42, %v2551_v11  ;;  %2184 = vrcp.f32 %v1342_v41 }
 0x2df   : > { %v2167_v47 = vpop.eup %2166  ;;  %1502 = vst.msk [vmem:[%s2566_s28 + $0x80] sm:$0xff] %vm1485_vm1, %v1469_v26  ;;  %2186 = vrcp.f32 %v1341_v43  ;;  %v1344_v48 = vadd.f32 1.0, %v2165_v44 }
 0x2e0   : > { %v2169_v49 = vpop.eup %2168  ;;  %v1472_v50 = vadd.f32 %v2557_v17, %v1436_v45  ;;  %v1435_v36 = vmul.f32 %v2167_v47, %v2551_v11  ;;  %2188 = vpow2.f32 %v1648_v24 }
 0x2e1   : > { %v2171_v51 = vpop.eup %2170  ;;  %v1438_v52 = vmul.f32 %v2169_v49, %v2551_v11  ;;  %2190 = vrcp.f32 %v1344_v48 }
 0x2e2   : > { %v2173_v53 = vpop.eup %2172  ;;  %1505 = vst.msk [vmem:[%s2566_s28 + $0x98] sm:$0xff] %vm1485_vm1, %v1472_v50  ;;  %v1471_v54 = vadd.f32 %v2557_v17, %v1435_v36  ;;  %v1437_v55 = vmul.f32 %v2171_v51, %v2551_v11 }
 0x2e3   : > { %v2175_v46 = vpop.eup %2174  ;;  %v1474_v57 = vadd.f32 %v2557_v17, %v1438_v52  ;;  %v1343_v58 = vadd.f32 1.0, %v2173_v53 }
 0x2e4   : > { %v2177_v59 = vpop.eup %2176  ;;  %1504 = vst.msk [vmem:[%s2566_s28 + $0x90] sm:$0xff] %vm1485_vm1, %v1471_v54  ;;  %v1473_v60 = vadd.f32 %v2557_v17, %v1437_v55  ;;  %v1346_v61 = vadd.f32 1.0, %v2175_v46 }
 0x2e5   : > { %v2179_v56 = vpop.eup %2178  ;;  %1507 = vst.msk [vmem:[%s2566_s28 + $0xa8] sm:$0xff] %vm1485_vm1, %v1474_v57  ;;  %v1440_v62 = vmul.f32 %v2177_v59, %v2551_v11  ;;  %2192 = vrcp.f32 %v1343_v58 }
 0x2e6   : > { %v2181_v63 = vpop.eup %2180  ;;  %1506 = vst.msk [vmem:[%s2566_s28 + $0xa0] sm:$0xff] %vm1485_vm1, %v1473_v60  ;;  %v1439_v0 = vmul.f32 %v2179_v56, %v2551_v11  ;;  %2194 = vrcp.f32 %v1346_v61 }
 0x2e7   : > { %v2183_v1 = vpop.eup %2182  ;;  %v1476_v3 = vadd.f32 %v2557_v17, %v1440_v62  ;;  %v1345_v4 = vadd.f32 1.0, %v2181_v63 }
 0x2e8   : > { %v2185_v2 = vpop.eup %2184  ;;  %v1475_v5 = vadd.f32 %v2557_v17, %v1439_v0  ;;  %v1348_v6 = vadd.f32 1.0, %v2183_v1 }
 0x2e9   : > { %v2187_v7 = vpop.eup %2186  ;;  %1509 = vst.msk [vmem:[%s2566_s28 + $0xb8] sm:$0xff] %vm1485_vm1, %v1476_v3  ;;  %v1442_v8 = vmul.f32 %v2185_v2, %v2551_v11  ;;  %2196 = vrcp.f32 %v1345_v4 }
 0x2ea   : > { %v2189_v9 = vpop.eup %2188  ;;  %1508 = vst.msk [vmem:[%s2566_s28 + $0xb0] sm:$0xff] %vm1485_vm1, %v1475_v5  ;;  %v1441_v10 = vmul.f32 %v2187_v7, %v2551_v11  ;;  %2198 = vrcp.f32 %v1348_v6 }
 0x2eb   : > { %v2191_v12 = vpop.eup %2190  ;;  %v1478_v13 = vadd.f32 %v2557_v17, %v1442_v8  ;;  %v1347_v14 = vadd.f32 1.0, %v2189_v9 }
 0x2ec   : > { %v1477_v15 = vadd.f32 %v2557_v17, %v1441_v10  ;;  %v1444_v18 = vmul.f32 %v2191_v12, %v2551_v11 }
 0x2ed   : > { %1511 = vst.msk [vmem:[%s2566_s28 + $0xc8] sm:$0xff] %vm1485_vm1, %v1478_v13  ;;  %2200 = vrcp.f32 %v1347_v14 }
 0x2ee   : > { %1510 = vst.msk [vmem:[%s2566_s28 + $0xc0] sm:$0xff] %vm1485_vm1, %v1477_v15  ;;  %v1480_v19 = vadd.f32 %v2557_v17, %v1444_v18 }
 0x2ef   : > { %v2193_v16 = vpop.eup %2192 }
 0x2f0   : > { %v2195_v20 = vpop.eup %2194  ;;  %1513 = vst.msk [vmem:[%s2566_s28 + $0xd8] sm:$0xff] %vm1485_vm1, %v1480_v19  ;;  %v1443_v22 = vmul.f32 %v2193_v16, %v2551_v11 }
 0x2f1   : > { %v1446_v23 = vmul.f32 %v2195_v20, %v2551_v11 }
 0x2f2   : > { %v1479_v25 = vadd.f32 %v2557_v17, %v1443_v22 }
 0x2f3   : > { %v2197_v21 = vpop.eup %2196  ;;  %v1482_v27 = vadd.f32 %v2557_v17, %v1446_v23 }
 0x2f4   : > { %v2199_v28 = vpop.eup %2198  ;;  %1512 = vst.msk [vmem:[%s2566_s28 + $0xd0] sm:$0xff] %vm1485_vm1, %v1479_v25  ;;  %v1445_v29 = vmul.f32 %v2197_v21, %v2551_v11 }
 0x2f5   : > { %1515 = vst.msk [vmem:[%s2566_s28 + $0xe8] sm:$0xff] %vm1485_vm1, %v1482_v27  ;;  %v1448_v30 = vmul.f32 %v2199_v28, %v2551_v11 }
 0x2f6   : > { %v1481_v31 = vadd.f32 %v2557_v17, %v1445_v29 }
 0x2f7   : > { %v2201_v32 = vpop.eup %2200  ;;  %v1484_v33 = vadd.f32 %v2557_v17, %v1448_v30 }
 0x2f8   : > { %1514 = vst.msk [vmem:[%s2566_s28 + $0xe0] sm:$0xff] %vm1485_vm1, %v1481_v31  ;;  %v1447_v34 = vmul.f32 %v2201_v32, %v2551_v11 }
 0x2f9   : > { %1517 = vst.msk [vmem:[%s2566_s28 + $0xf8] sm:$0xff] %vm1485_vm1, %v1484_v33 }
 0x2fa   : > { %v1483_v35 = vadd.f32 %v2557_v17, %v1447_v34 }
 0x2fc   : > { %1516 = vst.msk [vmem:[%s2566_s28 + $0xf0] sm:$0xff] %vm1485_vm1, %v1483_v35 }
 0x2fd PF: > { %s13_s12 = sadd.s32 1, %s2208_s12  }
 0x2fe   : > { %p10_p4 = scmp.ge.s32.totalorder %s13_s12, 4  }
 0x300   :  { %12 = sbr.rel (!%p10_p4) target bundleno = 1 (0x1), region = 62 }

</bundles_post_ra>
